<compile_context>
chip_gen: v7x
topology: tpu7x:2x2x1
jax: 0.10.0
libtpu: 0.0.40
codegen_flags: <defaults>
</compile_context>

<pallas_src>
import math

import jax
import jax.numpy as jnp
from jax.experimental import pallas as pl
from jax.experimental.pallas import tpu as pltpu

VMEM = pl.BlockSpec(memory_space=pltpu.MemorySpace.VMEM)
HPAD = 128          # lane-aligned width of each packed q/k/v section
LN_EPS = 1e-5       # torch.nn.LayerNorm default
NEG_INF = -1e30


# ----------------------------- in-kernel math helpers -------------------------
# These operate on f32 *values* (not refs); everything stays resident inside a
# single fused pallas_call per generator.


def _gelu(x):
    # exact erf form == torch.nn.GELU() default
    return 0.5 * x * (1.0 + jax.lax.erf(x * (1.0 / math.sqrt(2.0))))


def _relu(x):
    return jnp.maximum(x, 0.0)


def _linear(x, p, l=None, act=None):
    w = p["w"][...] if l is None else p["w"][l]
    b = p["b"][...] if l is None else p["b"][l]
    y = jnp.dot(x, w, preferred_element_type=jnp.float32) + b
    if act is not None:
        y = act(y)
    return y


def _layernorm(x, p, l=None, act=None):
    g = p["g"][...] if l is None else p["g"][l]
    b = p["b"][...] if l is None else p["b"][l]
    mu = jnp.mean(x, axis=-1, keepdims=True)
    var = jnp.mean(jnp.square(x - mu), axis=-1, keepdims=True)
    y = (x - mu) * jax.lax.rsqrt(var + LN_EPS) * g + b
    if act is not None:
        y = act(y)
    return y


def _mha_core(q, k, v, head_masks_ref, attn_bias, *, num_heads, head_dim):
    # q, k, v: (R, HPAD) head-group-padded activations.
    # Per-head restriction via multiplicative lane masks (no unaligned lane
    # slices, no transposes); per-batch restriction via additive block-diagonal
    # bias (single (R, R) score matmul covers all batches).
    scale = 1.0 / math.sqrt(head_dim)
    q = q * scale                                   # fold scale into q once
    acc = jnp.zeros(q.shape, jnp.float32)
    for hh in range(num_heads):                     # static, unrolled at trace
        hm = head_masks_ref[hh]                     # (1, HPAD)
        s = jax.lax.dot_general(                    # q @ k^T without k.T
            q * hm, k, (((1,), (1,)), ((), ())),
            preferred_element_type=jnp.float32)     # (R, R)
        s = s + attn_bias
        s = s - jnp.max(s, axis=-1, keepdims=True)
        pvals = jnp.exp(s)
        pvals = pvals * pl.reciprocal(
            jnp.sum(pvals, axis=-1, keepdims=True), approx=True)
        acc = acc + jnp.dot(pvals, v * hm, preferred_element_type=jnp.float32)
    return acc                                      # (R, HPAD)


def _cross_attention(q_in, kv_in, p, l, consts, *, num_heads, head_dim):
    # q projection (different input than k/v in cross-attention) + one fused
    # packed K/V matmul; sections are 128-lane aligned so the split is free.
    wq = p["wq"][...] if l is None else p["wq"][l]       # (h, HPAD)
    bq = p["bq"][...] if l is None else p["bq"][l]
    wkv = p["wkv"][...] if l is None else p["wkv"][l]    # (h, 2*HPAD)
    bkv = p["bkv"][...] if l is None else p["bkv"][l]
    wo = p["wo"][...] if l is None else p["wo"][l]       # (HPAD, h)
    bo = p["bo"][...] if l is None else p["bo"][l]
    q = jnp.dot(q_in, wq, preferred_element_type=jnp.float32) + bq      # (R, HPAD)
    kv = jnp.dot(kv_in, wkv, preferred_element_type=jnp.float32) + bkv  # (R, 2*HPAD)
    k = kv[:, :HPAD]
    v = kv[:, HPAD:]
    attn = _mha_core(q, k, v, consts["head_masks"], consts["attn_bias"][...],
                     num_heads=num_heads, head_dim=head_dim)
    return jnp.dot(attn, wo, preferred_element_type=jnp.float32) + bo   # (R, h)


def _modality_encoder(x, p):
    y = _linear(x, p["lin1"])
    y = _layernorm(y, p["ln1"], act=_relu)
    y = _linear(y, p["lin2"])
    return _layernorm(y, p["ln2"])


def _fusion_layer(xq, kv, p, l, consts, *, num_heads, head_dim):
    resid = xq
    qn = _layernorm(xq, p["ln1"], l)
    xq = resid + _cross_attention(qn, kv, p["attn"], l, consts,
                                  num_heads=num_heads, head_dim=head_dim)
    resid = xq
    y = _layernorm(xq, p["ln2"], l)
    y = _linear(y, p["ff1"], l, act=_gelu)
    y = _linear(y, p["ff2"], l)
    return resid + y


# ----------------------------- fused generator kernel bodies ------------------


def _text_to_image_body(x_ref, p, out_refs, *, num_heads, head_dim, num_fusion):
    x = x_ref[...].astype(jnp.float32)
    enc = _modality_encoder(x, p["encoder"])
    fused = enc
    for l in range(num_fusion):
        fused = _fusion_layer(fused, enc, p["fusion"], l, p["const"],
                              num_heads=num_heads, head_dim=head_dim)
    y = _linear(fused, p["dec1"], act=_relu)
    y = _linear(y, p["dec2"], act=jnp.tanh)
    out_refs[0][...] = y.astype(out_refs[0].dtype)


def _image_to_text_body(x_ref, p, out_refs, *, num_heads, head_dim, num_fusion):
    x = x_ref[...].astype(jnp.float32)
    enc = _modality_encoder(x, p["encoder"])
    fused = enc
    for l in range(num_fusion):
        fused = _fusion_layer(fused, enc, p["fusion"], l, p["const"],
                              num_heads=num_heads, head_dim=head_dim)
    y = _linear(fused, p["dec1"], act=_relu)
    y = _linear(y, p["dec2"])
    y = _layernorm(y, p["dec_ln"])
    out_refs[0][...] = y.astype(out_refs[0].dtype)


def _video_to_content_body(x_ref, p, out_refs, *, num_heads, head_dim, num_fusion):
    x = x_ref[...].astype(jnp.float32)
    enc = _modality_encoder(x, p["encoder"])
    temporal = _cross_attention(enc, enc, p["temporal"], None, p["const"],
                                num_heads=num_heads, head_dim=head_dim)
    fused = temporal
    for l in range(num_fusion):
        fused = _fusion_layer(fused, temporal, p["fusion"], l, p["const"],
                              num_heads=num_heads, head_dim=head_dim)
    # mean pool over the sequence via a single (B, R) @ (R, h) matmul
    pooled = jnp.dot(p["const"]["pool"][...], fused,
                     preferred_element_type=jnp.float32)          # (B, h)
    y = _linear(pooled, p["dec1"], act=_relu)
    content = _linear(y, p["dec2"])                               # (B, t+i)
    out_refs[0][...] = content.astype(out_refs[0].dtype)
    out_refs[1][...] = pooled.astype(out_refs[1].dtype)


# ----------------------------- pallas_call wrapper -----------------------------


def _build_consts(batch, seq, num_heads, head_dim, with_pool=False):
    assert num_heads * head_dim <= HPAD
    rows = batch * seq
    rb = jnp.arange(rows) // seq                         # batch id per row
    attn_bias = jnp.where(rb[:, None] == rb[None, :], 0.0, NEG_INF).astype(
        jnp.float32)                                     # (R, R) block-diagonal
    lane = jnp.arange(HPAD)
    lo = jnp.arange(num_heads) * head_dim
    head_masks = ((lane[None, :] >= lo[:, None]) &
                  (lane[None, :] < (lo[:, None] + head_dim))).astype(jnp.float32)
    consts = {"attn_bias": attn_bias,
              "head_masks": head_masks[:, None, :]}      # (H, 1, HPAD)
    if with_pool:
        pool = (jnp.arange(batch)[:, None] == rb[None, :]).astype(
            jnp.float32) / seq                           # (B, R)
        consts["pool"] = pool
    return consts


def _fused_generator_call(body, params, consts, x2d, out_shapes, **static):
    tree = dict(params)
    tree["const"] = consts
    leaves, treedef = jax.tree_util.tree_flatten(tree)
    n_leaves = len(leaves)

    def kernel(x_ref, *rest):
        p_refs = jax.tree_util.tree_unflatten(treedef, rest[:n_leaves])
        body(x_ref, p_refs, rest[n_leaves:], **static)

    return pl.pallas_call(
        kernel,
        out_shape=tuple(out_shapes),
        in_specs=[VMEM] * (1 + n_leaves),
        out_specs=tuple(VMEM for _ in out_shapes),
    )(x2d, *leaves)


# ----------------------------- parameter init ---------------------------------


def _uniform(key, shape, bound):
    return jax.random.uniform(key, shape, jnp.float32, -bound, bound)


def init_linear(key, fan_in, fan_out):
    # torch.nn.Linear default: U(-1/sqrt(fan_in), 1/sqrt(fan_in)) for W and b.
    kw, kb = jax.random.split(key)
    bound = 1.0 / math.sqrt(fan_in)
    return {"w": _uniform(kw, (fan_in, fan_out), bound),
            "b": _uniform(kb, (1, fan_out), bound)}


def init_layernorm(dim):
    return {"g": jnp.ones((1, dim), jnp.float32),
            "b": jnp.zeros((1, dim), jnp.float32)}


def _pack_qkv(wq, bq, wk, bk, wv, bv, wo, bo, h):
    # Pad each projection's output dim to HPAD lanes and pack K,V into a single
    # (h, 2*HPAD) matmul; output projection gets matching zero rows.
    assert h <= HPAD
    wq_p = jnp.zeros((h, HPAD), jnp.float32).at[:, :h].set(wq)
    bq_p = jnp.zeros((1, HPAD), jnp.float32).at[:, :h].set(bq)
    wkv_p = jnp.zeros((h, 2 * HPAD), jnp.float32)
    wkv_p = wkv_p.at[:, :h].set(wk).at[:, HPAD:HPAD + h].set(wv)
    bkv_p = jnp.zeros((1, 2 * HPAD), jnp.float32)
    bkv_p = bkv_p.at[:, :h].set(bk).at[:, HPAD:HPAD + h].set(bv)
    wo_p = jnp.zeros((HPAD, h), jnp.float32).at[:h, :].set(wo)
    return {"wq": wq_p, "bq": bq_p, "wkv": wkv_p, "bkv": bkv_p,
            "wo": wo_p, "bo": bo}


def init_cross_attention(key, h):
    # CrossModalAttention: four independent nn.Linear(h, h) layers.
    kq, kk, kv, ko = jax.random.split(key, 4)
    q = init_linear(kq, h, h)
    k = init_linear(kk, h, h)
    v = init_linear(kv, h, h)
    o = init_linear(ko, h, h)
    return _pack_qkv(q["w"], q["b"], k["w"], k["b"], v["w"], v["b"],
                     o["w"], o["b"], h)


def init_multihead_attention(key, h):
    # nn.MultiheadAttention defaults: xavier_uniform in_proj_weight (3h, h),
    # zero in_proj_bias, Linear-default out_proj.weight, zero out_proj.bias.
    kin, ko = jax.random.split(key)
    bound = math.sqrt(6.0 / (h + 3 * h))
    in_proj = _uniform(kin, (3 * h, h), bound)
    wq = in_proj[0:h].T
    wk = in_proj[h:2 * h].T
    wv = in_proj[2 * h:3 * h].T
    zb = jnp.zeros((1, h), jnp.float32)
    wo = _uniform(ko, (h, h), 1.0 / math.sqrt(h))
    return _pack_qkv(wq, zb, wk, zb, wv, zb, wo, zb, h)


def init_modality_encoder(key, in_dim, h):
    k1, k2 = jax.random.split(key)
    return {"lin1": init_linear(k1, in_dim, h), "ln1": init_layernorm(h),
            "lin2": init_linear(k2, h, h), "ln2": init_layernorm(h)}


def init_fusion_layers(key, h, n_layers):
    def one(k):
        ka, k1, k2 = jax.random.split(k, 3)
        return {"attn": init_cross_attention(ka, h),
                "ln1": init_layernorm(h), "ln2": init_layernorm(h),
                "ff1": init_linear(k1, h, 4 * h),
                "ff2": init_linear(k2, 4 * h, h)}
    layers = [one(k) for k in jax.random.split(key, n_layers)]
    # stack each leaf along a leading L axis -> static in-kernel loop over layers
    return jax.tree_util.tree_map(lambda *xs: jnp.stack(xs, axis=0), *layers)


def init_text_to_image(key, cfg):
    h = cfg["hidden_size"]
    ke, kf, k1, k2 = jax.random.split(key, 4)
    return {"encoder": init_modality_encoder(ke, cfg["text_encoder_dim"], h),
            "fusion": init_fusion_layers(kf, h, cfg["num_layers"] // 2),
            "dec1": init_linear(k1, h, 2 * h),
            "dec2": init_linear(k2, 2 * h, cfg["image_encoder_dim"])}


def init_image_to_text(key, cfg):
    h = cfg["hidden_size"]
    ke, kf, k1, k2 = jax.random.split(key, 4)
    return {"encoder": init_modality_encoder(ke, cfg["image_encoder_dim"], h),
            "fusion": init_fusion_layers(kf, h, cfg["num_layers"] // 2),
            "dec1": init_linear(k1, h, 2 * h),
            "dec2": init_linear(k2, 2 * h, cfg["text_encoder_dim"]),
            "dec_ln": init_layernorm(cfg["text_encoder_dim"])}


def init_video_to_content(key, cfg):
    h = cfg["hidden_size"]
    ke, kt, kf, k1, k2 = jax.random.split(key, 5)
    return {"encoder": init_modality_encoder(ke, cfg["video_encoder_dim"], h),
            "temporal": init_multihead_attention(kt, h),
            "fusion": init_fusion_layers(kf, h, cfg["num_layers"] // 2),
            "dec1": init_linear(k1, h, 2 * h),
            "dec2": init_linear(
                k2, 2 * h, cfg["text_encoder_dim"] + cfg["image_encoder_dim"])}


def init_cross_modal_generator(key, cfg):
    # coherence_scorer exists in __init__ but is unused in forward(); omitted.
    kt2i, ki2t, kv2c = jax.random.split(key, 3)
    return {"text_to_image": init_text_to_image(kt2i, cfg),
            "image_to_text": init_image_to_text(ki2t, cfg),
            "video_to_content": init_video_to_content(kv2c, cfg)}


# ----------------------------- forward (one pallas_call per generator) ---------


def text_to_image_fwd(p, text_features, cfg):
    B, S, _ = text_features.shape
    h, H = cfg["hidden_size"], cfg["num_heads"]
    hd = h // H
    x2 = text_features.reshape(B * S, -1)
    out, = _fused_generator_call(
        _text_to_image_body, p, _build_consts(B, S, H, hd), x2,
        (jax.ShapeDtypeStruct((B * S, cfg["image_encoder_dim"]),
                              text_features.dtype),),
        num_heads=H, head_dim=hd, num_fusion=cfg["num_layers"] // 2)
    return out.reshape(B, S, cfg["image_encoder_dim"])


def image_to_text_fwd(p, image_features, cfg):
    B, S, _ = image_features.shape
    h, H = cfg["hidden_size"], cfg["num_heads"]
    hd = h // H
    x2 = image_features.reshape(B * S, -1)
    out, = _fused_generator_call(
        _image_to_text_body, p, _build_consts(B, S, H, hd), x2,
        (jax.ShapeDtypeStruct((B * S, cfg["text_encoder_dim"]),
                              image_features.dtype),),
        num_heads=H, head_dim=hd, num_fusion=cfg["num_layers"] // 2)
    return out.reshape(B, S, cfg["text_encoder_dim"])


def video_to_content_fwd(p, video_features, cfg):
    B, S, _ = video_features.shape
    h, H = cfg["hidden_size"], cfg["num_heads"]
    hd = h // H
    t = cfg["text_encoder_dim"]
    x2 = video_features.reshape(B * S, -1)
    content, pooled = _fused_generator_call(
        _video_to_content_body, p,
        _build_consts(B, S, H, hd, with_pool=True), x2,
        (jax.ShapeDtypeStruct((B, t + cfg["image_encoder_dim"]),
                              video_features.dtype),
         jax.ShapeDtypeStruct((B, h), video_features.dtype)),
        num_heads=H, head_dim=hd, num_fusion=cfg["num_layers"] // 2)
    return {"text_features": content[:, :t],
            "image_features": content[:, t:],
            "fused_features": pooled}


def cross_modal_generator_fwd(params, modality_type, input_features, cfg):
    outputs = {}
    if modality_type == "text":
        outputs["generated_image"] = text_to_image_fwd(
            params["text_to_image"], input_features, cfg)
    if modality_type == "image":
        outputs["generated_text"] = image_to_text_fwd(
            params["image_to_text"], input_features, cfg)
    if modality_type == "video":
        outputs.update(video_to_content_fwd(
            params["video_to_content"], input_features, cfg))
    return outputs


# ----------------------------- main --------------------------------------------

if __name__ == "__main__":
    cfg = {
        "hidden_size": 32,
        "num_layers": 4,   # -> 2 fusion layers per generator
        "num_heads": 4,
        "text_encoder_dim": 24,
        "image_encoder_dim": 16,
        "video_encoder_dim": 32,
    }
    batch, seq = 2, 8

    key = jax.random.PRNGKey(0)
    kp, kt, ki, kv = jax.random.split(key, 4)
    params = init_cross_modal_generator(kp, cfg)

    text_in = jax.random.normal(kt, (batch, seq, cfg["text_encoder_dim"]), jnp.float32)
    image_in = jax.random.normal(ki, (batch, seq, cfg["image_encoder_dim"]), jnp.float32)
    video_in = jax.random.normal(kv, (batch, seq, cfg["video_encoder_dim"]), jnp.float32)

    out_text = cross_modal_generator_fwd(params, "text", text_in, cfg)
    out_image = cross_modal_generator_fwd(params, "image", image_in, cfg)
    out_video = cross_modal_generator_fwd(params, "video", video_in, cfg)

    jax.block_until_ready((out_text, out_image, out_video))

    assert out_text["generated_image"].shape == (batch, seq, cfg["image_encoder_dim"])
    assert out_image["generated_text"].shape == (batch, seq, cfg["text_encoder_dim"])
    assert out_video["text_features"].shape == (batch, cfg["text_encoder_dim"])
    assert out_video["image_features"].shape == (batch, cfg["image_encoder_dim"])
    assert out_video["fused_features"].shape == (batch, cfg["hidden_size"])

    print("KERNEL_OK")
</pallas_src>

<mosaic_0001>
module attributes {stable_mosaic.version = 11 : i64} {
  func.func @kernel(%arg0: memref<16x24xf32, #tpu.memory_space<vmem>>, %arg1: memref<16x16xf32, #tpu.memory_space<vmem>>, %arg2: memref<4x1x128xf32, #tpu.memory_space<vmem>>, %arg3: memref<1x64xf32, #tpu.memory_space<vmem>>, %arg4: memref<32x64xf32, #tpu.memory_space<vmem>>, %arg5: memref<1x16xf32, #tpu.memory_space<vmem>>, %arg6: memref<64x16xf32, #tpu.memory_space<vmem>>, %arg7: memref<1x32xf32, #tpu.memory_space<vmem>>, %arg8: memref<24x32xf32, #tpu.memory_space<vmem>>, %arg9: memref<1x32xf32, #tpu.memory_space<vmem>>, %arg10: memref<32x32xf32, #tpu.memory_space<vmem>>, %arg11: memref<1x32xf32, #tpu.memory_space<vmem>>, %arg12: memref<1x32xf32, #tpu.memory_space<vmem>>, %arg13: memref<1x32xf32, #tpu.memory_space<vmem>>, %arg14: memref<1x32xf32, #tpu.memory_space<vmem>>, %arg15: memref<2x1x256xf32, #tpu.memory_space<vmem>>, %arg16: memref<2x1x32xf32, #tpu.memory_space<vmem>>, %arg17: memref<2x1x128xf32, #tpu.memory_space<vmem>>, %arg18: memref<2x32x256xf32, #tpu.memory_space<vmem>>, %arg19: memref<2x128x32xf32, #tpu.memory_space<vmem>>, %arg20: memref<2x32x128xf32, #tpu.memory_space<vmem>>, %arg21: memref<2x1x128xf32, #tpu.memory_space<vmem>>, %arg22: memref<2x32x128xf32, #tpu.memory_space<vmem>>, %arg23: memref<2x1x32xf32, #tpu.memory_space<vmem>>, %arg24: memref<2x128x32xf32, #tpu.memory_space<vmem>>, %arg25: memref<2x1x32xf32, #tpu.memory_space<vmem>>, %arg26: memref<2x1x32xf32, #tpu.memory_space<vmem>>, %arg27: memref<2x1x32xf32, #tpu.memory_space<vmem>>, %arg28: memref<2x1x32xf32, #tpu.memory_space<vmem>>, %arg29: memref<16x16xf32, #tpu.memory_space<vmem>>) attributes {dimension_semantics = [], scalar_prefetch = 0 : i64, scratch_operands = 0 : i64, tpu.core_type = #tpu.core_type<tc>} {
    %c0 = arith.constant 0 : index
    %c0_0 = arith.constant 0 : index
    %0 = vector.load %arg0[%c0, %c0_0] : memref<16x24xf32, #tpu.memory_space<vmem>>, vector<16x24xf32>
    %c0_1 = arith.constant 0 : index
    %c0_2 = arith.constant 0 : index
    %1 = vector.load %arg8[%c0_1, %c0_2] : memref<24x32xf32, #tpu.memory_space<vmem>>, vector<24x32xf32>
    %c0_3 = arith.constant 0 : index
    %c0_4 = arith.constant 0 : index
    %2 = vector.load %arg7[%c0_3, %c0_4] : memref<1x32xf32, #tpu.memory_space<vmem>>, vector<1x32xf32>
    %cst = arith.constant dense<0.000000e+00> : vector<16x32xf32>
    %3 = tpu.matmul %0, %1, %cst {dimension_numbers = #tpu.dot_dimension_numbers<[1], [0], [0], [1], [0, 0, 1, 1], [], []>} : vector<16x24xf32>, vector<24x32xf32>, vector<16x32xf32> -> vector<16x32xf32>
    %4 = vector.broadcast %2 : vector<1x32xf32> to vector<16x32xf32>
    %5 = arith.addf %3, %4 : vector<16x32xf32>
    %c0_5 = arith.constant 0 : index
    %c0_6 = arith.constant 0 : index
    %6 = vector.load %arg12[%c0_5, %c0_6] : memref<1x32xf32, #tpu.memory_space<vmem>>, vector<1x32xf32>
    %c0_7 = arith.constant 0 : index
    %c0_8 = arith.constant 0 : index
    %7 = vector.load %arg11[%c0_7, %c0_8] : memref<1x32xf32, #tpu.memory_space<vmem>>, vector<1x32xf32>
    %cst_9 = arith.constant dense<0.000000e+00> : vector<16xf32>
    %8 = vector.multi_reduction <add>, %5, %cst_9 [1] : vector<16x32xf32> to vector<16xf32>
    %9 = vector.shape_cast %8 : vector<16xf32> to vector<16x1xf32>
    %cst_10 = arith.constant 3.200000e+01 : f32
    %10 = vector.broadcast %cst_10 : f32 to vector<16x1xf32>
    %11 = arith.divf %9, %10 : vector<16x1xf32>
    %12 = vector.broadcast %11 : vector<16x1xf32> to vector<16x32xf32>
    %13 = arith.subf %5, %12 : vector<16x32xf32>
    %14 = arith.mulf %13, %13 : vector<16x32xf32>
    %cst_11 = arith.constant dense<0.000000e+00> : vector<16xf32>
    %15 = vector.multi_reduction <add>, %14, %cst_11 [1] : vector<16x32xf32> to vector<16xf32>
    %16 = vector.shape_cast %15 : vector<16xf32> to vector<16x1xf32>
    %cst_12 = arith.constant 3.200000e+01 : f32
    %17 = vector.broadcast %cst_12 : f32 to vector<16x1xf32>
    %18 = arith.divf %16, %17 : vector<16x1xf32>
    %19 = vector.broadcast %11 : vector<16x1xf32> to vector<16x32xf32>
    %20 = arith.subf %5, %19 : vector<16x32xf32>
    %cst_13 = arith.constant 9.99999974E-6 : f32
    %21 = vector.broadcast %cst_13 : f32 to vector<16x1xf32>
    %22 = arith.addf %18, %21 : vector<16x1xf32>
    %23 = math.rsqrt %22 : vector<16x1xf32>
    %24 = vector.broadcast %23 : vector<16x1xf32> to vector<16x32xf32>
    %25 = arith.mulf %20, %24 : vector<16x32xf32>
    %26 = vector.broadcast %6 : vector<1x32xf32> to vector<16x32xf32>
    %27 = arith.mulf %25, %26 : vector<16x32xf32>
    %28 = vector.broadcast %7 : vector<1x32xf32> to vector<16x32xf32>
    %29 = arith.addf %27, %28 : vector<16x32xf32>
    %cst_14 = arith.constant 0.000000e+00 : f32
    %30 = vector.broadcast %cst_14 : f32 to vector<16x32xf32>
    %31 = arith.maximumf %29, %30 : vector<16x32xf32>
    %c0_15 = arith.constant 0 : index
    %c0_16 = arith.constant 0 : index
    %32 = vector.load %arg10[%c0_15, %c0_16] : memref<32x32xf32, #tpu.memory_space<vmem>>, vector<32x32xf32>
    %c0_17 = arith.constant 0 : index
    %c0_18 = arith.constant 0 : index
    %33 = vector.load %arg9[%c0_17, %c0_18] : memref<1x32xf32, #tpu.memory_space<vmem>>, vector<1x32xf32>
    %cst_19 = arith.constant dense<0.000000e+00> : vector<16x32xf32>
    %34 = tpu.matmul %31, %32, %cst_19 {dimension_numbers = #tpu.dot_dimension_numbers<[1], [0], [0], [1], [0, 0, 1, 1], [], []>} : vector<16x32xf32>, vector<32x32xf32>, vector<16x32xf32> -> vector<16x32xf32>
    %35 = vector.broadcast %33 : vector<1x32xf32> to vector<16x32xf32>
    %36 = arith.addf %34, %35 : vector<16x32xf32>
    %c0_20 = arith.constant 0 : index
    %c0_21 = arith.constant 0 : index
    %37 = vector.load %arg14[%c0_20, %c0_21] : memref<1x32xf32, #tpu.memory_space<vmem>>, vector<1x32xf32>
    %c0_22 = arith.constant 0 : index
    %c0_23 = arith.constant 0 : index
    %38 = vector.load %arg13[%c0_22, %c0_23] : memref<1x32xf32, #tpu.memory_space<vmem>>, vector<1x32xf32>
    %cst_24 = arith.constant dense<0.000000e+00> : vector<16xf32>
    %39 = vector.multi_reduction <add>, %36, %cst_24 [1] : vector<16x32xf32> to vector<16xf32>
    %40 = vector.shape_cast %39 : vector<16xf32> to vector<16x1xf32>
    %cst_25 = arith.constant 3.200000e+01 : f32
    %41 = vector.broadcast %cst_25 : f32 to vector<16x1xf32>
    %42 = arith.divf %40, %41 : vector<16x1xf32>
    %43 = vector.broadcast %42 : vector<16x1xf32> to vector<16x32xf32>
    %44 = arith.subf %36, %43 : vector<16x32xf32>
    %45 = arith.mulf %44, %44 : vector<16x32xf32>
    %cst_26 = arith.constant dense<0.000000e+00> : vector<16xf32>
    %46 = vector.multi_reduction <add>, %45, %cst_26 [1] : vector<16x32xf32> to vector<16xf32>
    %47 = vector.shape_cast %46 : vector<16xf32> to vector<16x1xf32>
    %cst_27 = arith.constant 3.200000e+01 : f32
    %48 = vector.broadcast %cst_27 : f32 to vector<16x1xf32>
    %49 = arith.divf %47, %48 : vector<16x1xf32>
    %50 = vector.broadcast %42 : vector<16x1xf32> to vector<16x32xf32>
    %51 = arith.subf %36, %50 : vector<16x32xf32>
    %cst_28 = arith.constant 9.99999974E-6 : f32
    %52 = vector.broadcast %cst_28 : f32 to vector<16x1xf32>
    %53 = arith.addf %49, %52 : vector<16x1xf32>
    %54 = math.rsqrt %53 : vector<16x1xf32>
    %55 = vector.broadcast %54 : vector<16x1xf32> to vector<16x32xf32>
    %56 = arith.mulf %51, %55 : vector<16x32xf32>
    %57 = vector.broadcast %37 : vector<1x32xf32> to vector<16x32xf32>
    %58 = arith.mulf %56, %57 : vector<16x32xf32>
    %59 = vector.broadcast %38 : vector<1x32xf32> to vector<16x32xf32>
    %60 = arith.addf %58, %59 : vector<16x32xf32>
    %c0_29 = arith.constant 0 : index
    %c0_30 = arith.constant 0 : index
    %c0_31 = arith.constant 0 : index
    %61 = vector.load %arg26[%c0_29, %c0_30, %c0_31] : memref<2x1x32xf32, #tpu.memory_space<vmem>>, vector<1x1x32xf32>
    %62 = vector.shape_cast %61 : vector<1x1x32xf32> to vector<1x32xf32>
    %c0_32 = arith.constant 0 : index
    %c0_33 = arith.constant 0 : index
    %c0_34 = arith.constant 0 : index
    %63 = vector.load %arg25[%c0_32, %c0_33, %c0_34] : memref<2x1x32xf32, #tpu.memory_space<vmem>>, vector<1x1x32xf32>
    %64 = vector.shape_cast %63 : vector<1x1x32xf32> to vector<1x32xf32>
    %cst_35 = arith.constant dense<0.000000e+00> : vector<16xf32>
    %65 = vector.multi_reduction <add>, %60, %cst_35 [1] : vector<16x32xf32> to vector<16xf32>
    %66 = vector.shape_cast %65 : vector<16xf32> to vector<16x1xf32>
    %cst_36 = arith.constant 3.200000e+01 : f32
    %67 = vector.broadcast %cst_36 : f32 to vector<16x1xf32>
    %68 = arith.divf %66, %67 : vector<16x1xf32>
    %69 = vector.broadcast %68 : vector<16x1xf32> to vector<16x32xf32>
    %70 = arith.subf %60, %69 : vector<16x32xf32>
    %71 = arith.mulf %70, %70 : vector<16x32xf32>
    %cst_37 = arith.constant dense<0.000000e+00> : vector<16xf32>
    %72 = vector.multi_reduction <add>, %71, %cst_37 [1] : vector<16x32xf32> to vector<16xf32>
    %73 = vector.shape_cast %72 : vector<16xf32> to vector<16x1xf32>
    %cst_38 = arith.constant 3.200000e+01 : f32
    %74 = vector.broadcast %cst_38 : f32 to vector<16x1xf32>
    %75 = arith.divf %73, %74 : vector<16x1xf32>
    %76 = vector.broadcast %68 : vector<16x1xf32> to vector<16x32xf32>
    %77 = arith.subf %60, %76 : vector<16x32xf32>
    %cst_39 = arith.constant 9.99999974E-6 : f32
    %78 = vector.broadcast %cst_39 : f32 to vector<16x1xf32>
    %79 = arith.addf %75, %78 : vector<16x1xf32>
    %80 = math.rsqrt %79 : vector<16x1xf32>
    %81 = vector.broadcast %80 : vector<16x1xf32> to vector<16x32xf32>
    %82 = arith.mulf %77, %81 : vector<16x32xf32>
    %83 = vector.broadcast %62 : vector<1x32xf32> to vector<16x32xf32>
    %84 = arith.mulf %82, %83 : vector<16x32xf32>
    %85 = vector.broadcast %64 : vector<1x32xf32> to vector<16x32xf32>
    %86 = arith.addf %84, %85 : vector<16x32xf32>
    %c0_40 = arith.constant 0 : index
    %c0_41 = arith.constant 0 : index
    %c0_42 = arith.constant 0 : index
    %87 = vector.load %arg20[%c0_40, %c0_41, %c0_42] : memref<2x32x128xf32, #tpu.memory_space<vmem>>, vector<1x32x128xf32>
    %88 = vector.shape_cast %87 : vector<1x32x128xf32> to vector<32x128xf32>
    %c0_43 = arith.constant 0 : index
    %c0_44 = arith.constant 0 : index
    %c0_45 = arith.constant 0 : index
    %89 = vector.load %arg17[%c0_43, %c0_44, %c0_45] : memref<2x1x128xf32, #tpu.memory_space<vmem>>, vector<1x1x128xf32>
    %90 = vector.shape_cast %89 : vector<1x1x128xf32> to vector<1x128xf32>
    %c0_46 = arith.constant 0 : index
    %c0_47 = arith.constant 0 : index
    %c0_48 = arith.constant 0 : index
    %91 = vector.load %arg18[%c0_46, %c0_47, %c0_48] : memref<2x32x256xf32, #tpu.memory_space<vmem>>, vector<1x32x256xf32>
    %92 = vector.shape_cast %91 : vector<1x32x256xf32> to vector<32x256xf32>
    %c0_49 = arith.constant 0 : index
    %c0_50 = arith.constant 0 : index
    %c0_51 = arith.constant 0 : index
    %93 = vector.load %arg15[%c0_49, %c0_50, %c0_51] : memref<2x1x256xf32, #tpu.memory_space<vmem>>, vector<1x1x256xf32>
    %94 = vector.shape_cast %93 : vector<1x1x256xf32> to vector<1x256xf32>
    %c0_52 = arith.constant 0 : index
    %c0_53 = arith.constant 0 : index
    %c0_54 = arith.constant 0 : index
    %95 = vector.load %arg19[%c0_52, %c0_53, %c0_54] : memref<2x128x32xf32, #tpu.memory_space<vmem>>, vector<1x128x32xf32>
    %96 = vector.shape_cast %95 : vector<1x128x32xf32> to vector<128x32xf32>
    %c0_55 = arith.constant 0 : index
    %c0_56 = arith.constant 0 : index
    %c0_57 = arith.constant 0 : index
    %97 = vector.load %arg16[%c0_55, %c0_56, %c0_57] : memref<2x1x32xf32, #tpu.memory_space<vmem>>, vector<1x1x32xf32>
    %98 = vector.shape_cast %97 : vector<1x1x32xf32> to vector<1x32xf32>
    %cst_58 = arith.constant dense<0.000000e+00> : vector<16x128xf32>
    %99 = tpu.matmul %86, %88, %cst_58 {dimension_numbers = #tpu.dot_dimension_numbers<[1], [0], [0], [1], [0, 0, 1, 1], [], []>} : vector<16x32xf32>, vector<32x128xf32>, vector<16x128xf32> -> vector<16x128xf32>
    %100 = vector.broadcast %90 : vector<1x128xf32> to vector<16x128xf32>
    %101 = arith.addf %99, %100 : vector<16x128xf32>
    %cst_59 = arith.constant dense<0.000000e+00> : vector<16x256xf32>
    %102 = tpu.matmul %60, %92, %cst_59 {dimension_numbers = #tpu.dot_dimension_numbers<[1], [0], [0], [1], [0, 0, 1, 1], [], []>} : vector<16x32xf32>, vector<32x256xf32>, vector<16x256xf32> -> vector<16x256xf32>
    %103 = vector.broadcast %94 : vector<1x256xf32> to vector<16x256xf32>
    %104 = arith.addf %102, %103 : vector<16x256xf32>
    %105 = vector.extract_strided_slice %104 {offsets = [0, 0], sizes = [16, 128], strides = [1, 1]} : vector<16x256xf32> to vector<16x128xf32>
    %106 = vector.extract_strided_slice %104 {offsets = [0, 128], sizes = [16, 128], strides = [1, 1]} : vector<16x256xf32> to vector<16x128xf32>
    %c0_60 = arith.constant 0 : index
    %c0_61 = arith.constant 0 : index
    %107 = vector.load %arg1[%c0_60, %c0_61] : memref<16x16xf32, #tpu.memory_space<vmem>>, vector<16x16xf32>
    %cst_62 = arith.constant 0.353553385 : f32
    %108 = vector.broadcast %cst_62 : f32 to vector<16x128xf32>
    %109 = arith.mulf %101, %108 : vector<16x128xf32>
    %cst_63 = arith.constant 0.000000e+00 : f32
    %110 = vector.broadcast %cst_63 : f32 to vector<16x128xf32>
    %c0_64 = arith.constant 0 : index
    %c0_65 = arith.constant 0 : index
    %c0_66 = arith.constant 0 : index
    %111 = vector.load %arg2[%c0_64, %c0_65, %c0_66] : memref<4x1x128xf32, #tpu.memory_space<vmem>>, vector<1x1x128xf32>
    %112 = vector.shape_cast %111 : vector<1x1x128xf32> to vector<1x128xf32>
    %113 = vector.broadcast %112 : vector<1x128xf32> to vector<16x128xf32>
    %114 = arith.mulf %109, %113 : vector<16x128xf32>
    %cst_67 = arith.constant dense<0.000000e+00> : vector<16x16xf32>
    %115 = tpu.matmul %114, %105, %cst_67 {dimension_numbers = #tpu.dot_dimension_numbers<[1], [1], [0], [0], [0, 0, 1, 0], [], []>} : vector<16x128xf32>, vector<16x128xf32>, vector<16x16xf32> -> vector<16x16xf32>
    %116 = arith.addf %115, %107 : vector<16x16xf32>
    %cst_68 = arith.constant dense<0xFF800000> : vector<16xf32>
    %117 = vector.multi_reduction <maximumf>, %116, %cst_68 [1] : vector<16x16xf32> to vector<16xf32>
    %118 = vector.shape_cast %117 : vector<16xf32> to vector<16x1xf32>
    %119 = vector.broadcast %118 : vector<16x1xf32> to vector<16x16xf32>
    %120 = arith.subf %116, %119 : vector<16x16xf32>
    %121 = math.exp %120 : vector<16x16xf32>
    %cst_69 = arith.constant dense<0.000000e+00> : vector<16xf32>
    %122 = vector.multi_reduction <add>, %121, %cst_69 [1] : vector<16x16xf32> to vector<16xf32>
    %123 = vector.shape_cast %122 : vector<16xf32> to vector<16x1xf32>
    %124 = tpu.reciprocal %123 {approx = true} : vector<16x1xf32> -> vector<16x1xf32>
    %125 = vector.broadcast %124 : vector<16x1xf32> to vector<16x16xf32>
    %126 = arith.mulf %121, %125 : vector<16x16xf32>
    %127 = vector.broadcast %112 : vector<1x128xf32> to vector<16x128xf32>
    %128 = arith.mulf %106, %127 : vector<16x128xf32>
    %cst_70 = arith.constant dense<0.000000e+00> : vector<16x128xf32>
    %129 = tpu.matmul %126, %128, %cst_70 {dimension_numbers = #tpu.dot_dimension_numbers<[1], [0], [0], [1], [0, 0, 1, 1], [], []>} : vector<16x16xf32>, vector<16x128xf32>, vector<16x128xf32> -> vector<16x128xf32>
    %130 = arith.addf %110, %129 : vector<16x128xf32>
    %c1 = arith.constant 1 : index
    %c0_71 = arith.constant 0 : index
    %c0_72 = arith.constant 0 : index
    %131 = vector.load %arg2[%c1, %c0_71, %c0_72] : memref<4x1x128xf32, #tpu.memory_space<vmem>>, vector<1x1x128xf32>
    %132 = vector.shape_cast %131 : vector<1x1x128xf32> to vector<1x128xf32>
    %133 = vector.broadcast %132 : vector<1x128xf32> to vector<16x128xf32>
    %134 = arith.mulf %109, %133 : vector<16x128xf32>
    %cst_73 = arith.constant dense<0.000000e+00> : vector<16x16xf32>
    %135 = tpu.matmul %134, %105, %cst_73 {dimension_numbers = #tpu.dot_dimension_numbers<[1], [1], [0], [0], [0, 0, 1, 0], [], []>} : vector<16x128xf32>, vector<16x128xf32>, vector<16x16xf32> -> vector<16x16xf32>
    %136 = arith.addf %135, %107 : vector<16x16xf32>
    %cst_74 = arith.constant dense<0xFF800000> : vector<16xf32>
    %137 = vector.multi_reduction <maximumf>, %136, %cst_74 [1] : vector<16x16xf32> to vector<16xf32>
    %138 = vector.shape_cast %137 : vector<16xf32> to vector<16x1xf32>
    %139 = vector.broadcast %138 : vector<16x1xf32> to vector<16x16xf32>
    %140 = arith.subf %136, %139 : vector<16x16xf32>
    %141 = math.exp %140 : vector<16x16xf32>
    %cst_75 = arith.constant dense<0.000000e+00> : vector<16xf32>
    %142 = vector.multi_reduction <add>, %141, %cst_75 [1] : vector<16x16xf32> to vector<16xf32>
    %143 = vector.shape_cast %142 : vector<16xf32> to vector<16x1xf32>
    %144 = tpu.reciprocal %143 {approx = true} : vector<16x1xf32> -> vector<16x1xf32>
    %145 = vector.broadcast %144 : vector<16x1xf32> to vector<16x16xf32>
    %146 = arith.mulf %141, %145 : vector<16x16xf32>
    %147 = vector.broadcast %132 : vector<1x128xf32> to vector<16x128xf32>
    %148 = arith.mulf %106, %147 : vector<16x128xf32>
    %cst_76 = arith.constant dense<0.000000e+00> : vector<16x128xf32>
    %149 = tpu.matmul %146, %148, %cst_76 {dimension_numbers = #tpu.dot_dimension_numbers<[1], [0], [0], [1], [0, 0, 1, 1], [], []>} : vector<16x16xf32>, vector<16x128xf32>, vector<16x128xf32> -> vector<16x128xf32>
    %150 = arith.addf %130, %149 : vector<16x128xf32>
    %c2 = arith.constant 2 : index
    %c0_77 = arith.constant 0 : index
    %c0_78 = arith.constant 0 : index
    %151 = vector.load %arg2[%c2, %c0_77, %c0_78] : memref<4x1x128xf32, #tpu.memory_space<vmem>>, vector<1x1x128xf32>
    %152 = vector.shape_cast %151 : vector<1x1x128xf32> to vector<1x128xf32>
    %153 = vector.broadcast %152 : vector<1x128xf32> to vector<16x128xf32>
    %154 = arith.mulf %109, %153 : vector<16x128xf32>
    %cst_79 = arith.constant dense<0.000000e+00> : vector<16x16xf32>
    %155 = tpu.matmul %154, %105, %cst_79 {dimension_numbers = #tpu.dot_dimension_numbers<[1], [1], [0], [0], [0, 0, 1, 0], [], []>} : vector<16x128xf32>, vector<16x128xf32>, vector<16x16xf32> -> vector<16x16xf32>
    %156 = arith.addf %155, %107 : vector<16x16xf32>
    %cst_80 = arith.constant dense<0xFF800000> : vector<16xf32>
    %157 = vector.multi_reduction <maximumf>, %156, %cst_80 [1] : vector<16x16xf32> to vector<16xf32>
    %158 = vector.shape_cast %157 : vector<16xf32> to vector<16x1xf32>
    %159 = vector.broadcast %158 : vector<16x1xf32> to vector<16x16xf32>
    %160 = arith.subf %156, %159 : vector<16x16xf32>
    %161 = math.exp %160 : vector<16x16xf32>
    %cst_81 = arith.constant dense<0.000000e+00> : vector<16xf32>
    %162 = vector.multi_reduction <add>, %161, %cst_81 [1] : vector<16x16xf32> to vector<16xf32>
    %163 = vector.shape_cast %162 : vector<16xf32> to vector<16x1xf32>
    %164 = tpu.reciprocal %163 {approx = true} : vector<16x1xf32> -> vector<16x1xf32>
    %165 = vector.broadcast %164 : vector<16x1xf32> to vector<16x16xf32>
    %166 = arith.mulf %161, %165 : vector<16x16xf32>
    %167 = vector.broadcast %152 : vector<1x128xf32> to vector<16x128xf32>
    %168 = arith.mulf %106, %167 : vector<16x128xf32>
    %cst_82 = arith.constant dense<0.000000e+00> : vector<16x128xf32>
    %169 = tpu.matmul %166, %168, %cst_82 {dimension_numbers = #tpu.dot_dimension_numbers<[1], [0], [0], [1], [0, 0, 1, 1], [], []>} : vector<16x16xf32>, vector<16x128xf32>, vector<16x128xf32> -> vector<16x128xf32>
    %170 = arith.addf %150, %169 : vector<16x128xf32>
    %c3 = arith.constant 3 : index
    %c0_83 = arith.constant 0 : index
    %c0_84 = arith.constant 0 : index
    %171 = vector.load %arg2[%c3, %c0_83, %c0_84] : memref<4x1x128xf32, #tpu.memory_space<vmem>>, vector<1x1x128xf32>
    %172 = vector.shape_cast %171 : vector<1x1x128xf32> to vector<1x128xf32>
    %173 = vector.broadcast %172 : vector<1x128xf32> to vector<16x128xf32>
    %174 = arith.mulf %109, %173 : vector<16x128xf32>
    %cst_85 = arith.constant dense<0.000000e+00> : vector<16x16xf32>
    %175 = tpu.matmul %174, %105, %cst_85 {dimension_numbers = #tpu.dot_dimension_numbers<[1], [1], [0], [0], [0, 0, 1, 0], [], []>} : vector<16x128xf32>, vector<16x128xf32>, vector<16x16xf32> -> vector<16x16xf32>
    %176 = arith.addf %175, %107 : vector<16x16xf32>
    %cst_86 = arith.constant dense<0xFF800000> : vector<16xf32>
    %177 = vector.multi_reduction <maximumf>, %176, %cst_86 [1] : vector<16x16xf32> to vector<16xf32>
    %178 = vector.shape_cast %177 : vector<16xf32> to vector<16x1xf32>
    %179 = vector.broadcast %178 : vector<16x1xf32> to vector<16x16xf32>
    %180 = arith.subf %176, %179 : vector<16x16xf32>
    %181 = math.exp %180 : vector<16x16xf32>
    %cst_87 = arith.constant dense<0.000000e+00> : vector<16xf32>
    %182 = vector.multi_reduction <add>, %181, %cst_87 [1] : vector<16x16xf32> to vector<16xf32>
    %183 = vector.shape_cast %182 : vector<16xf32> to vector<16x1xf32>
    %184 = tpu.reciprocal %183 {approx = true} : vector<16x1xf32> -> vector<16x1xf32>
    %185 = vector.broadcast %184 : vector<16x1xf32> to vector<16x16xf32>
    %186 = arith.mulf %181, %185 : vector<16x16xf32>
    %187 = vector.broadcast %172 : vector<1x128xf32> to vector<16x128xf32>
    %188 = arith.mulf %106, %187 : vector<16x128xf32>
    %cst_88 = arith.constant dense<0.000000e+00> : vector<16x128xf32>
    %189 = tpu.matmul %186, %188, %cst_88 {dimension_numbers = #tpu.dot_dimension_numbers<[1], [0], [0], [1], [0, 0, 1, 1], [], []>} : vector<16x16xf32>, vector<16x128xf32>, vector<16x128xf32> -> vector<16x128xf32>
    %190 = arith.addf %170, %189 : vector<16x128xf32>
    %cst_89 = arith.constant dense<0.000000e+00> : vector<16x32xf32>
    %191 = tpu.matmul %190, %96, %cst_89 {dimension_numbers = #tpu.dot_dimension_numbers<[1], [0], [0], [1], [0, 0, 1, 1], [], []>} : vector<16x128xf32>, vector<128x32xf32>, vector<16x32xf32> -> vector<16x32xf32>
    %192 = vector.broadcast %98 : vector<1x32xf32> to vector<16x32xf32>
    %193 = arith.addf %191, %192 : vector<16x32xf32>
    %194 = arith.addf %60, %193 : vector<16x32xf32>
    %c0_90 = arith.constant 0 : index
    %c0_91 = arith.constant 0 : index
    %c0_92 = arith.constant 0 : index
    %195 = vector.load %arg28[%c0_90, %c0_91, %c0_92] : memref<2x1x32xf32, #tpu.memory_space<vmem>>, vector<1x1x32xf32>
    %196 = vector.shape_cast %195 : vector<1x1x32xf32> to vector<1x32xf32>
    %c0_93 = arith.constant 0 : index
    %c0_94 = arith.constant 0 : index
    %c0_95 = arith.constant 0 : index
    %197 = vector.load %arg27[%c0_93, %c0_94, %c0_95] : memref<2x1x32xf32, #tpu.memory_space<vmem>>, vector<1x1x32xf32>
    %198 = vector.shape_cast %197 : vector<1x1x32xf32> to vector<1x32xf32>
    %cst_96 = arith.constant dense<0.000000e+00> : vector<16xf32>
    %199 = vector.multi_reduction <add>, %194, %cst_96 [1] : vector<16x32xf32> to vector<16xf32>
    %200 = vector.shape_cast %199 : vector<16xf32> to vector<16x1xf32>
    %cst_97 = arith.constant 3.200000e+01 : f32
    %201 = vector.broadcast %cst_97 : f32 to vector<16x1xf32>
    %202 = arith.divf %200, %201 : vector<16x1xf32>
    %203 = vector.broadcast %202 : vector<16x1xf32> to vector<16x32xf32>
    %204 = arith.subf %194, %203 : vector<16x32xf32>
    %205 = arith.mulf %204, %204 : vector<16x32xf32>
    %cst_98 = arith.constant dense<0.000000e+00> : vector<16xf32>
    %206 = vector.multi_reduction <add>, %205, %cst_98 [1] : vector<16x32xf32> to vector<16xf32>
    %207 = vector.shape_cast %206 : vector<16xf32> to vector<16x1xf32>
    %cst_99 = arith.constant 3.200000e+01 : f32
    %208 = vector.broadcast %cst_99 : f32 to vector<16x1xf32>
    %209 = arith.divf %207, %208 : vector<16x1xf32>
    %210 = vector.broadcast %202 : vector<16x1xf32> to vector<16x32xf32>
    %211 = arith.subf %194, %210 : vector<16x32xf32>
    %cst_100 = arith.constant 9.99999974E-6 : f32
    %212 = vector.broadcast %cst_100 : f32 to vector<16x1xf32>
    %213 = arith.addf %209, %212 : vector<16x1xf32>
    %214 = math.rsqrt %213 : vector<16x1xf32>
    %215 = vector.broadcast %214 : vector<16x1xf32> to vector<16x32xf32>
    %216 = arith.mulf %211, %215 : vector<16x32xf32>
    %217 = vector.broadcast %196 : vector<1x32xf32> to vector<16x32xf32>
    %218 = arith.mulf %216, %217 : vector<16x32xf32>
    %219 = vector.broadcast %198 : vector<1x32xf32> to vector<16x32xf32>
    %220 = arith.addf %218, %219 : vector<16x32xf32>
    %c0_101 = arith.constant 0 : index
    %c0_102 = arith.constant 0 : index
    %c0_103 = arith.constant 0 : index
    %221 = vector.load %arg22[%c0_101, %c0_102, %c0_103] : memref<2x32x128xf32, #tpu.memory_space<vmem>>, vector<1x32x128xf32>
    %222 = vector.shape_cast %221 : vector<1x32x128xf32> to vector<32x128xf32>
    %c0_104 = arith.constant 0 : index
    %c0_105 = arith.constant 0 : index
    %c0_106 = arith.constant 0 : index
    %223 = vector.load %arg21[%c0_104, %c0_105, %c0_106] : memref<2x1x128xf32, #tpu.memory_space<vmem>>, vector<1x1x128xf32>
    %224 = vector.shape_cast %223 : vector<1x1x128xf32> to vector<1x128xf32>
    %cst_107 = arith.constant dense<0.000000e+00> : vector<16x128xf32>
    %225 = tpu.matmul %220, %222, %cst_107 {dimension_numbers = #tpu.dot_dimension_numbers<[1], [0], [0], [1], [0, 0, 1, 1], [], []>} : vector<16x32xf32>, vector<32x128xf32>, vector<16x128xf32> -> vector<16x128xf32>
    %226 = vector.broadcast %224 : vector<1x128xf32> to vector<16x128xf32>
    %227 = arith.addf %225, %226 : vector<16x128xf32>
    %cst_108 = arith.constant 5.000000e-01 : f32
    %228 = vector.broadcast %cst_108 : f32 to vector<16x128xf32>
    %229 = arith.mulf %228, %227 : vector<16x128xf32>
    %cst_109 = arith.constant 0.707106769 : f32
    %230 = vector.broadcast %cst_109 : f32 to vector<16x128xf32>
    %231 = arith.mulf %227, %230 : vector<16x128xf32>
    %232 = math.erf %231 : vector<16x128xf32>
    %cst_110 = arith.constant 1.000000e+00 : f32
    %233 = vector.broadcast %cst_110 : f32 to vector<16x128xf32>
    %234 = arith.addf %233, %232 : vector<16x128xf32>
    %235 = arith.mulf %229, %234 : vector<16x128xf32>
    %c0_111 = arith.constant 0 : index
    %c0_112 = arith.constant 0 : index
    %c0_113 = arith.constant 0 : index
    %236 = vector.load %arg24[%c0_111, %c0_112, %c0_113] : memref<2x128x32xf32, #tpu.memory_space<vmem>>, vector<1x128x32xf32>
    %237 = vector.shape_cast %236 : vector<1x128x32xf32> to vector<128x32xf32>
    %c0_114 = arith.constant 0 : index
    %c0_115 = arith.constant 0 : index
    %c0_116 = arith.constant 0 : index
    %238 = vector.load %arg23[%c0_114, %c0_115, %c0_116] : memref<2x1x32xf32, #tpu.memory_space<vmem>>, vector<1x1x32xf32>
    %239 = vector.shape_cast %238 : vector<1x1x32xf32> to vector<1x32xf32>
    %cst_117 = arith.constant dense<0.000000e+00> : vector<16x32xf32>
    %240 = tpu.matmul %235, %237, %cst_117 {dimension_numbers = #tpu.dot_dimension_numbers<[1], [0], [0], [1], [0, 0, 1, 1], [], []>} : vector<16x128xf32>, vector<128x32xf32>, vector<16x32xf32> -> vector<16x32xf32>
    %241 = vector.broadcast %239 : vector<1x32xf32> to vector<16x32xf32>
    %242 = arith.addf %240, %241 : vector<16x32xf32>
    %243 = arith.addf %194, %242 : vector<16x32xf32>
    %c1_118 = arith.constant 1 : index
    %c0_119 = arith.constant 0 : index
    %c0_120 = arith.constant 0 : index
    %244 = vector.load %arg26[%c1_118, %c0_119, %c0_120] : memref<2x1x32xf32, #tpu.memory_space<vmem>>, vector<1x1x32xf32>
    %245 = vector.shape_cast %244 : vector<1x1x32xf32> to vector<1x32xf32>
    %c1_121 = arith.constant 1 : index
    %c0_122 = arith.constant 0 : index
    %c0_123 = arith.constant 0 : index
    %246 = vector.load %arg25[%c1_121, %c0_122, %c0_123] : memref<2x1x32xf32, #tpu.memory_space<vmem>>, vector<1x1x32xf32>
    %247 = vector.shape_cast %246 : vector<1x1x32xf32> to vector<1x32xf32>
    %cst_124 = arith.constant dense<0.000000e+00> : vector<16xf32>
    %248 = vector.multi_reduction <add>, %243, %cst_124 [1] : vector<16x32xf32> to vector<16xf32>
    %249 = vector.shape_cast %248 : vector<16xf32> to vector<16x1xf32>
    %cst_125 = arith.constant 3.200000e+01 : f32
    %250 = vector.broadcast %cst_125 : f32 to vector<16x1xf32>
    %251 = arith.divf %249, %250 : vector<16x1xf32>
    %252 = vector.broadcast %251 : vector<16x1xf32> to vector<16x32xf32>
    %253 = arith.subf %243, %252 : vector<16x32xf32>
    %254 = arith.mulf %253, %253 : vector<16x32xf32>
    %cst_126 = arith.constant dense<0.000000e+00> : vector<16xf32>
    %255 = vector.multi_reduction <add>, %254, %cst_126 [1] : vector<16x32xf32> to vector<16xf32>
    %256 = vector.shape_cast %255 : vector<16xf32> to vector<16x1xf32>
    %cst_127 = arith.constant 3.200000e+01 : f32
    %257 = vector.broadcast %cst_127 : f32 to vector<16x1xf32>
    %258 = arith.divf %256, %257 : vector<16x1xf32>
    %259 = vector.broadcast %251 : vector<16x1xf32> to vector<16x32xf32>
    %260 = arith.subf %243, %259 : vector<16x32xf32>
    %cst_128 = arith.constant 9.99999974E-6 : f32
    %261 = vector.broadcast %cst_128 : f32 to vector<16x1xf32>
    %262 = arith.addf %258, %261 : vector<16x1xf32>
    %263 = math.rsqrt %262 : vector<16x1xf32>
    %264 = vector.broadcast %263 : vector<16x1xf32> to vector<16x32xf32>
    %265 = arith.mulf %260, %264 : vector<16x32xf32>
    %266 = vector.broadcast %245 : vector<1x32xf32> to vector<16x32xf32>
    %267 = arith.mulf %265, %266 : vector<16x32xf32>
    %268 = vector.broadcast %247 : vector<1x32xf32> to vector<16x32xf32>
    %269 = arith.addf %267, %268 : vector<16x32xf32>
    %c1_129 = arith.constant 1 : index
    %c0_130 = arith.constant 0 : index
    %c0_131 = arith.constant 0 : index
    %270 = vector.load %arg20[%c1_129, %c0_130, %c0_131] : memref<2x32x128xf32, #tpu.memory_space<vmem>>, vector<1x32x128xf32>
    %271 = vector.shape_cast %270 : vector<1x32x128xf32> to vector<32x128xf32>
    %c1_132 = arith.constant 1 : index
    %c0_133 = arith.constant 0 : index
    %c0_134 = arith.constant 0 : index
    %272 = vector.load %arg17[%c1_132, %c0_133, %c0_134] : memref<2x1x128xf32, #tpu.memory_space<vmem>>, vector<1x1x128xf32>
    %273 = vector.shape_cast %272 : vector<1x1x128xf32> to vector<1x128xf32>
    %c1_135 = arith.constant 1 : index
    %c0_136 = arith.constant 0 : index
    %c0_137 = arith.constant 0 : index
    %274 = vector.load %arg18[%c1_135, %c0_136, %c0_137] : memref<2x32x256xf32, #tpu.memory_space<vmem>>, vector<1x32x256xf32>
    %275 = vector.shape_cast %274 : vector<1x32x256xf32> to vector<32x256xf32>
    %c1_138 = arith.constant 1 : index
    %c0_139 = arith.constant 0 : index
    %c0_140 = arith.constant 0 : index
    %276 = vector.load %arg15[%c1_138, %c0_139, %c0_140] : memref<2x1x256xf32, #tpu.memory_space<vmem>>, vector<1x1x256xf32>
    %277 = vector.shape_cast %276 : vector<1x1x256xf32> to vector<1x256xf32>
    %c1_141 = arith.constant 1 : index
    %c0_142 = arith.constant 0 : index
    %c0_143 = arith.constant 0 : index
    %278 = vector.load %arg19[%c1_141, %c0_142, %c0_143] : memref<2x128x32xf32, #tpu.memory_space<vmem>>, vector<1x128x32xf32>
    %279 = vector.shape_cast %278 : vector<1x128x32xf32> to vector<128x32xf32>
    %c1_144 = arith.constant 1 : index
    %c0_145 = arith.constant 0 : index
    %c0_146 = arith.constant 0 : index
    %280 = vector.load %arg16[%c1_144, %c0_145, %c0_146] : memref<2x1x32xf32, #tpu.memory_space<vmem>>, vector<1x1x32xf32>
    %281 = vector.shape_cast %280 : vector<1x1x32xf32> to vector<1x32xf32>
    %cst_147 = arith.constant dense<0.000000e+00> : vector<16x128xf32>
    %282 = tpu.matmul %269, %271, %cst_147 {dimension_numbers = #tpu.dot_dimension_numbers<[1], [0], [0], [1], [0, 0, 1, 1], [], []>} : vector<16x32xf32>, vector<32x128xf32>, vector<16x128xf32> -> vector<16x128xf32>
    %283 = vector.broadcast %273 : vector<1x128xf32> to vector<16x128xf32>
    %284 = arith.addf %282, %283 : vector<16x128xf32>
    %cst_148 = arith.constant dense<0.000000e+00> : vector<16x256xf32>
    %285 = tpu.matmul %60, %275, %cst_148 {dimension_numbers = #tpu.dot_dimension_numbers<[1], [0], [0], [1], [0, 0, 1, 1], [], []>} : vector<16x32xf32>, vector<32x256xf32>, vector<16x256xf32> -> vector<16x256xf32>
    %286 = vector.broadcast %277 : vector<1x256xf32> to vector<16x256xf32>
    %287 = arith.addf %285, %286 : vector<16x256xf32>
    %288 = vector.extract_strided_slice %287 {offsets = [0, 0], sizes = [16, 128], strides = [1, 1]} : vector<16x256xf32> to vector<16x128xf32>
    %289 = vector.extract_strided_slice %287 {offsets = [0, 128], sizes = [16, 128], strides = [1, 1]} : vector<16x256xf32> to vector<16x128xf32>
    %c0_149 = arith.constant 0 : index
    %c0_150 = arith.constant 0 : index
    %290 = vector.load %arg1[%c0_149, %c0_150] : memref<16x16xf32, #tpu.memory_space<vmem>>, vector<16x16xf32>
    %cst_151 = arith.constant 0.353553385 : f32
    %291 = vector.broadcast %cst_151 : f32 to vector<16x128xf32>
    %292 = arith.mulf %284, %291 : vector<16x128xf32>
    %cst_152 = arith.constant 0.000000e+00 : f32
    %293 = vector.broadcast %cst_152 : f32 to vector<16x128xf32>
    %c0_153 = arith.constant 0 : index
    %c0_154 = arith.constant 0 : index
    %c0_155 = arith.constant 0 : index
    %294 = vector.load %arg2[%c0_153, %c0_154, %c0_155] : memref<4x1x128xf32, #tpu.memory_space<vmem>>, vector<1x1x128xf32>
    %295 = vector.shape_cast %294 : vector<1x1x128xf32> to vector<1x128xf32>
    %296 = vector.broadcast %295 : vector<1x128xf32> to vector<16x128xf32>
    %297 = arith.mulf %292, %296 : vector<16x128xf32>
    %cst_156 = arith.constant dense<0.000000e+00> : vector<16x16xf32>
    %298 = tpu.matmul %297, %288, %cst_156 {dimension_numbers = #tpu.dot_dimension_numbers<[1], [1], [0], [0], [0, 0, 1, 0], [], []>} : vector<16x128xf32>, vector<16x128xf32>, vector<16x16xf32> -> vector<16x16xf32>
    %299 = arith.addf %298, %290 : vector<16x16xf32>
    %cst_157 = arith.constant dense<0xFF800000> : vector<16xf32>
    %300 = vector.multi_reduction <maximumf>, %299, %cst_157 [1] : vector<16x16xf32> to vector<16xf32>
    %301 = vector.shape_cast %300 : vector<16xf32> to vector<16x1xf32>
    %302 = vector.broadcast %301 : vector<16x1xf32> to vector<16x16xf32>
    %303 = arith.subf %299, %302 : vector<16x16xf32>
    %304 = math.exp %303 : vector<16x16xf32>
    %cst_158 = arith.constant dense<0.000000e+00> : vector<16xf32>
    %305 = vector.multi_reduction <add>, %304, %cst_158 [1] : vector<16x16xf32> to vector<16xf32>
    %306 = vector.shape_cast %305 : vector<16xf32> to vector<16x1xf32>
    %307 = tpu.reciprocal %306 {approx = true} : vector<16x1xf32> -> vector<16x1xf32>
    %308 = vector.broadcast %307 : vector<16x1xf32> to vector<16x16xf32>
    %309 = arith.mulf %304, %308 : vector<16x16xf32>
    %310 = vector.broadcast %295 : vector<1x128xf32> to vector<16x128xf32>
    %311 = arith.mulf %289, %310 : vector<16x128xf32>
    %cst_159 = arith.constant dense<0.000000e+00> : vector<16x128xf32>
    %312 = tpu.matmul %309, %311, %cst_159 {dimension_numbers = #tpu.dot_dimension_numbers<[1], [0], [0], [1], [0, 0, 1, 1], [], []>} : vector<16x16xf32>, vector<16x128xf32>, vector<16x128xf32> -> vector<16x128xf32>
    %313 = arith.addf %293, %312 : vector<16x128xf32>
    %c1_160 = arith.constant 1 : index
    %c0_161 = arith.constant 0 : index
    %c0_162 = arith.constant 0 : index
    %314 = vector.load %arg2[%c1_160, %c0_161, %c0_162] : memref<4x1x128xf32, #tpu.memory_space<vmem>>, vector<1x1x128xf32>
    %315 = vector.shape_cast %314 : vector<1x1x128xf32> to vector<1x128xf32>
    %316 = vector.broadcast %315 : vector<1x128xf32> to vector<16x128xf32>
    %317 = arith.mulf %292, %316 : vector<16x128xf32>
    %cst_163 = arith.constant dense<0.000000e+00> : vector<16x16xf32>
    %318 = tpu.matmul %317, %288, %cst_163 {dimension_numbers = #tpu.dot_dimension_numbers<[1], [1], [0], [0], [0, 0, 1, 0], [], []>} : vector<16x128xf32>, vector<16x128xf32>, vector<16x16xf32> -> vector<16x16xf32>
    %319 = arith.addf %318, %290 : vector<16x16xf32>
    %cst_164 = arith.constant dense<0xFF800000> : vector<16xf32>
    %320 = vector.multi_reduction <maximumf>, %319, %cst_164 [1] : vector<16x16xf32> to vector<16xf32>
    %321 = vector.shape_cast %320 : vector<16xf32> to vector<16x1xf32>
    %322 = vector.broadcast %321 : vector<16x1xf32> to vector<16x16xf32>
    %323 = arith.subf %319, %322 : vector<16x16xf32>
    %324 = math.exp %323 : vector<16x16xf32>
    %cst_165 = arith.constant dense<0.000000e+00> : vector<16xf32>
    %325 = vector.multi_reduction <add>, %324, %cst_165 [1] : vector<16x16xf32> to vector<16xf32>
    %326 = vector.shape_cast %325 : vector<16xf32> to vector<16x1xf32>
    %327 = tpu.reciprocal %326 {approx = true} : vector<16x1xf32> -> vector<16x1xf32>
    %328 = vector.broadcast %327 : vector<16x1xf32> to vector<16x16xf32>
    %329 = arith.mulf %324, %328 : vector<16x16xf32>
    %330 = vector.broadcast %315 : vector<1x128xf32> to vector<16x128xf32>
    %331 = arith.mulf %289, %330 : vector<16x128xf32>
    %cst_166 = arith.constant dense<0.000000e+00> : vector<16x128xf32>
    %332 = tpu.matmul %329, %331, %cst_166 {dimension_numbers = #tpu.dot_dimension_numbers<[1], [0], [0], [1], [0, 0, 1, 1], [], []>} : vector<16x16xf32>, vector<16x128xf32>, vector<16x128xf32> -> vector<16x128xf32>
    %333 = arith.addf %313, %332 : vector<16x128xf32>
    %c2_167 = arith.constant 2 : index
    %c0_168 = arith.constant 0 : index
    %c0_169 = arith.constant 0 : index
    %334 = vector.load %arg2[%c2_167, %c0_168, %c0_169] : memref<4x1x128xf32, #tpu.memory_space<vmem>>, vector<1x1x128xf32>
    %335 = vector.shape_cast %334 : vector<1x1x128xf32> to vector<1x128xf32>
    %336 = vector.broadcast %335 : vector<1x128xf32> to vector<16x128xf32>
    %337 = arith.mulf %292, %336 : vector<16x128xf32>
    %cst_170 = arith.constant dense<0.000000e+00> : vector<16x16xf32>
    %338 = tpu.matmul %337, %288, %cst_170 {dimension_numbers = #tpu.dot_dimension_numbers<[1], [1], [0], [0], [0, 0, 1, 0], [], []>} : vector<16x128xf32>, vector<16x128xf32>, vector<16x16xf32> -> vector<16x16xf32>
    %339 = arith.addf %338, %290 : vector<16x16xf32>
    %cst_171 = arith.constant dense<0xFF800000> : vector<16xf32>
    %340 = vector.multi_reduction <maximumf>, %339, %cst_171 [1] : vector<16x16xf32> to vector<16xf32>
    %341 = vector.shape_cast %340 : vector<16xf32> to vector<16x1xf32>
    %342 = vector.broadcast %341 : vector<16x1xf32> to vector<16x16xf32>
    %343 = arith.subf %339, %342 : vector<16x16xf32>
    %344 = math.exp %343 : vector<16x16xf32>
    %cst_172 = arith.constant dense<0.000000e+00> : vector<16xf32>
    %345 = vector.multi_reduction <add>, %344, %cst_172 [1] : vector<16x16xf32> to vector<16xf32>
    %346 = vector.shape_cast %345 : vector<16xf32> to vector<16x1xf32>
    %347 = tpu.reciprocal %346 {approx = true} : vector<16x1xf32> -> vector<16x1xf32>
    %348 = vector.broadcast %347 : vector<16x1xf32> to vector<16x16xf32>
    %349 = arith.mulf %344, %348 : vector<16x16xf32>
    %350 = vector.broadcast %335 : vector<1x128xf32> to vector<16x128xf32>
    %351 = arith.mulf %289, %350 : vector<16x128xf32>
    %cst_173 = arith.constant dense<0.000000e+00> : vector<16x128xf32>
    %352 = tpu.matmul %349, %351, %cst_173 {dimension_numbers = #tpu.dot_dimension_numbers<[1], [0], [0], [1], [0, 0, 1, 1], [], []>} : vector<16x16xf32>, vector<16x128xf32>, vector<16x128xf32> -> vector<16x128xf32>
    %353 = arith.addf %333, %352 : vector<16x128xf32>
    %c3_174 = arith.constant 3 : index
    %c0_175 = arith.constant 0 : index
    %c0_176 = arith.constant 0 : index
    %354 = vector.load %arg2[%c3_174, %c0_175, %c0_176] : memref<4x1x128xf32, #tpu.memory_space<vmem>>, vector<1x1x128xf32>
    %355 = vector.shape_cast %354 : vector<1x1x128xf32> to vector<1x128xf32>
    %356 = vector.broadcast %355 : vector<1x128xf32> to vector<16x128xf32>
    %357 = arith.mulf %292, %356 : vector<16x128xf32>
    %cst_177 = arith.constant dense<0.000000e+00> : vector<16x16xf32>
    %358 = tpu.matmul %357, %288, %cst_177 {dimension_numbers = #tpu.dot_dimension_numbers<[1], [1], [0], [0], [0, 0, 1, 0], [], []>} : vector<16x128xf32>, vector<16x128xf32>, vector<16x16xf32> -> vector<16x16xf32>
    %359 = arith.addf %358, %290 : vector<16x16xf32>
    %cst_178 = arith.constant dense<0xFF800000> : vector<16xf32>
    %360 = vector.multi_reduction <maximumf>, %359, %cst_178 [1] : vector<16x16xf32> to vector<16xf32>
    %361 = vector.shape_cast %360 : vector<16xf32> to vector<16x1xf32>
    %362 = vector.broadcast %361 : vector<16x1xf32> to vector<16x16xf32>
    %363 = arith.subf %359, %362 : vector<16x16xf32>
    %364 = math.exp %363 : vector<16x16xf32>
    %cst_179 = arith.constant dense<0.000000e+00> : vector<16xf32>
    %365 = vector.multi_reduction <add>, %364, %cst_179 [1] : vector<16x16xf32> to vector<16xf32>
    %366 = vector.shape_cast %365 : vector<16xf32> to vector<16x1xf32>
    %367 = tpu.reciprocal %366 {approx = true} : vector<16x1xf32> -> vector<16x1xf32>
    %368 = vector.broadcast %367 : vector<16x1xf32> to vector<16x16xf32>
    %369 = arith.mulf %364, %368 : vector<16x16xf32>
    %370 = vector.broadcast %355 : vector<1x128xf32> to vector<16x128xf32>
    %371 = arith.mulf %289, %370 : vector<16x128xf32>
    %cst_180 = arith.constant dense<0.000000e+00> : vector<16x128xf32>
    %372 = tpu.matmul %369, %371, %cst_180 {dimension_numbers = #tpu.dot_dimension_numbers<[1], [0], [0], [1], [0, 0, 1, 1], [], []>} : vector<16x16xf32>, vector<16x128xf32>, vector<16x128xf32> -> vector<16x128xf32>
    %373 = arith.addf %353, %372 : vector<16x128xf32>
    %cst_181 = arith.constant dense<0.000000e+00> : vector<16x32xf32>
    %374 = tpu.matmul %373, %279, %cst_181 {dimension_numbers = #tpu.dot_dimension_numbers<[1], [0], [0], [1], [0, 0, 1, 1], [], []>} : vector<16x128xf32>, vector<128x32xf32>, vector<16x32xf32> -> vector<16x32xf32>
    %375 = vector.broadcast %281 : vector<1x32xf32> to vector<16x32xf32>
    %376 = arith.addf %374, %375 : vector<16x32xf32>
    %377 = arith.addf %243, %376 : vector<16x32xf32>
    %c1_182 = arith.constant 1 : index
    %c0_183 = arith.constant 0 : index
    %c0_184 = arith.constant 0 : index
    %378 = vector.load %arg28[%c1_182, %c0_183, %c0_184] : memref<2x1x32xf32, #tpu.memory_space<vmem>>, vector<1x1x32xf32>
    %379 = vector.shape_cast %378 : vector<1x1x32xf32> to vector<1x32xf32>
    %c1_185 = arith.constant 1 : index
    %c0_186 = arith.constant 0 : index
    %c0_187 = arith.constant 0 : index
    %380 = vector.load %arg27[%c1_185, %c0_186, %c0_187] : memref<2x1x32xf32, #tpu.memory_space<vmem>>, vector<1x1x32xf32>
    %381 = vector.shape_cast %380 : vector<1x1x32xf32> to vector<1x32xf32>
    %cst_188 = arith.constant dense<0.000000e+00> : vector<16xf32>
    %382 = vector.multi_reduction <add>, %377, %cst_188 [1] : vector<16x32xf32> to vector<16xf32>
    %383 = vector.shape_cast %382 : vector<16xf32> to vector<16x1xf32>
    %cst_189 = arith.constant 3.200000e+01 : f32
    %384 = vector.broadcast %cst_189 : f32 to vector<16x1xf32>
    %385 = arith.divf %383, %384 : vector<16x1xf32>
    %386 = vector.broadcast %385 : vector<16x1xf32> to vector<16x32xf32>
    %387 = arith.subf %377, %386 : vector<16x32xf32>
    %388 = arith.mulf %387, %387 : vector<16x32xf32>
    %cst_190 = arith.constant dense<0.000000e+00> : vector<16xf32>
    %389 = vector.multi_reduction <add>, %388, %cst_190 [1] : vector<16x32xf32> to vector<16xf32>
    %390 = vector.shape_cast %389 : vector<16xf32> to vector<16x1xf32>
    %cst_191 = arith.constant 3.200000e+01 : f32
    %391 = vector.broadcast %cst_191 : f32 to vector<16x1xf32>
    %392 = arith.divf %390, %391 : vector<16x1xf32>
    %393 = vector.broadcast %385 : vector<16x1xf32> to vector<16x32xf32>
    %394 = arith.subf %377, %393 : vector<16x32xf32>
    %cst_192 = arith.constant 9.99999974E-6 : f32
    %395 = vector.broadcast %cst_192 : f32 to vector<16x1xf32>
    %396 = arith.addf %392, %395 : vector<16x1xf32>
    %397 = math.rsqrt %396 : vector<16x1xf32>
    %398 = vector.broadcast %397 : vector<16x1xf32> to vector<16x32xf32>
    %399 = arith.mulf %394, %398 : vector<16x32xf32>
    %400 = vector.broadcast %379 : vector<1x32xf32> to vector<16x32xf32>
    %401 = arith.mulf %399, %400 : vector<16x32xf32>
    %402 = vector.broadcast %381 : vector<1x32xf32> to vector<16x32xf32>
    %403 = arith.addf %401, %402 : vector<16x32xf32>
    %c1_193 = arith.constant 1 : index
    %c0_194 = arith.constant 0 : index
    %c0_195 = arith.constant 0 : index
    %404 = vector.load %arg22[%c1_193, %c0_194, %c0_195] : memref<2x32x128xf32, #tpu.memory_space<vmem>>, vector<1x32x128xf32>
    %405 = vector.shape_cast %404 : vector<1x32x128xf32> to vector<32x128xf32>
    %c1_196 = arith.constant 1 : index
    %c0_197 = arith.constant 0 : index
    %c0_198 = arith.constant 0 : index
    %406 = vector.load %arg21[%c1_196, %c0_197, %c0_198] : memref<2x1x128xf32, #tpu.memory_space<vmem>>, vector<1x1x128xf32>
    %407 = vector.shape_cast %406 : vector<1x1x128xf32> to vector<1x128xf32>
    %cst_199 = arith.constant dense<0.000000e+00> : vector<16x128xf32>
    %408 = tpu.matmul %403, %405, %cst_199 {dimension_numbers = #tpu.dot_dimension_numbers<[1], [0], [0], [1], [0, 0, 1, 1], [], []>} : vector<16x32xf32>, vector<32x128xf32>, vector<16x128xf32> -> vector<16x128xf32>
    %409 = vector.broadcast %407 : vector<1x128xf32> to vector<16x128xf32>
    %410 = arith.addf %408, %409 : vector<16x128xf32>
    %cst_200 = arith.constant 5.000000e-01 : f32
    %411 = vector.broadcast %cst_200 : f32 to vector<16x128xf32>
    %412 = arith.mulf %411, %410 : vector<16x128xf32>
    %cst_201 = arith.constant 0.707106769 : f32
    %413 = vector.broadcast %cst_201 : f32 to vector<16x128xf32>
    %414 = arith.mulf %410, %413 : vector<16x128xf32>
    %415 = math.erf %414 : vector<16x128xf32>
    %cst_202 = arith.constant 1.000000e+00 : f32
    %416 = vector.broadcast %cst_202 : f32 to vector<16x128xf32>
    %417 = arith.addf %416, %415 : vector<16x128xf32>
    %418 = arith.mulf %412, %417 : vector<16x128xf32>
    %c1_203 = arith.constant 1 : index
    %c0_204 = arith.constant 0 : index
    %c0_205 = arith.constant 0 : index
    %419 = vector.load %arg24[%c1_203, %c0_204, %c0_205] : memref<2x128x32xf32, #tpu.memory_space<vmem>>, vector<1x128x32xf32>
    %420 = vector.shape_cast %419 : vector<1x128x32xf32> to vector<128x32xf32>
    %c1_206 = arith.constant 1 : index
    %c0_207 = arith.constant 0 : index
    %c0_208 = arith.constant 0 : index
    %421 = vector.load %arg23[%c1_206, %c0_207, %c0_208] : memref<2x1x32xf32, #tpu.memory_space<vmem>>, vector<1x1x32xf32>
    %422 = vector.shape_cast %421 : vector<1x1x32xf32> to vector<1x32xf32>
    %cst_209 = arith.constant dense<0.000000e+00> : vector<16x32xf32>
    %423 = tpu.matmul %418, %420, %cst_209 {dimension_numbers = #tpu.dot_dimension_numbers<[1], [0], [0], [1], [0, 0, 1, 1], [], []>} : vector<16x128xf32>, vector<128x32xf32>, vector<16x32xf32> -> vector<16x32xf32>
    %424 = vector.broadcast %422 : vector<1x32xf32> to vector<16x32xf32>
    %425 = arith.addf %423, %424 : vector<16x32xf32>
    %426 = arith.addf %377, %425 : vector<16x32xf32>
    %c0_210 = arith.constant 0 : index
    %c0_211 = arith.constant 0 : index
    %427 = vector.load %arg4[%c0_210, %c0_211] : memref<32x64xf32, #tpu.memory_space<vmem>>, vector<32x64xf32>
    %c0_212 = arith.constant 0 : index
    %c0_213 = arith.constant 0 : index
    %428 = vector.load %arg3[%c0_212, %c0_213] : memref<1x64xf32, #tpu.memory_space<vmem>>, vector<1x64xf32>
    %cst_214 = arith.constant dense<0.000000e+00> : vector<16x64xf32>
    %429 = tpu.matmul %426, %427, %cst_214 {dimension_numbers = #tpu.dot_dimension_numbers<[1], [0], [0], [1], [0, 0, 1, 1], [], []>} : vector<16x32xf32>, vector<32x64xf32>, vector<16x64xf32> -> vector<16x64xf32>
    %430 = vector.broadcast %428 : vector<1x64xf32> to vector<16x64xf32>
    %431 = arith.addf %429, %430 : vector<16x64xf32>
    %cst_215 = arith.constant 0.000000e+00 : f32
    %432 = vector.broadcast %cst_215 : f32 to vector<16x64xf32>
    %433 = arith.maximumf %431, %432 : vector<16x64xf32>
    %c0_216 = arith.constant 0 : index
    %c0_217 = arith.constant 0 : index
    %434 = vector.load %arg6[%c0_216, %c0_217] : memref<64x16xf32, #tpu.memory_space<vmem>>, vector<64x16xf32>
    %c0_218 = arith.constant 0 : index
    %c0_219 = arith.constant 0 : index
    %435 = vector.load %arg5[%c0_218, %c0_219] : memref<1x16xf32, #tpu.memory_space<vmem>>, vector<1x16xf32>
    %cst_220 = arith.constant dense<0.000000e+00> : vector<16x16xf32>
    %436 = tpu.matmul %433, %434, %cst_220 {dimension_numbers = #tpu.dot_dimension_numbers<[1], [0], [0], [1], [0, 0, 1, 1], [], []>} : vector<16x64xf32>, vector<64x16xf32>, vector<16x16xf32> -> vector<16x16xf32>
    %437 = vector.broadcast %435 : vector<1x16xf32> to vector<16x16xf32>
    %438 = arith.addf %436, %437 : vector<16x16xf32>
    %439 = math.tanh %438 : vector<16x16xf32>
    %c0_221 = arith.constant 0 : index
    %c0_222 = arith.constant 0 : index
    %440 = vector.load %arg29[%c0_221, %c0_222] : memref<16x16xf32, #tpu.memory_space<vmem>>, vector<16x16xf32>
    tpu.vector_store %arg29[%c0_221, %c0_222], %439 {strides = array<i32>} : memref<16x16xf32, #tpu.memory_space<vmem>>, vector<16x16xf32>,
    return
  }
}

</mosaic_0001>

<bundles_post_ra>
// kernel: tpu_custom_call.1
= control target key start
LH: loop header
LB: loop body
LE: loop exit
PB: predicated region body
PF: predicated region fallthrough
CT: control target
= control target key end

     0   :  { %s4426_s6 = smov 1   ;;  %s4427_s10 = smov 2   ;;  %s5040_s0 = inlined_call_operand.smem [shape: u32[30], index: -1, kind: input, shape index: {}] }
   0x1   :  { %s4467_s5 = sld [smem:[%s5040_s0]]   ;;  %s4428_s14 = smov 3  }
   0x2   :  { %s4472_s9 = sld [smem:[%s5040_s0 + %s4426_s6]]   ;;  %s4429_s18 = smov 4  }
   0x3   :  { %s4477_s13 = sld [smem:[%s5040_s0 + %s4427_s10]]   ;;  %s4430_s22 = smov 5  }
   0x4   :  { %s4482_s17 = sld [smem:[%s5040_s0 + %s4428_s14]]   ;;  %s4431_s26 = smov 6  }
   0x5   :  { %s4487_s21 = sld [smem:[%s5040_s0 + %s4429_s18]]   ;;  %s4432_s30 = smov 7  }
   0x6   :  { %s4492_s25 = sld [smem:[%s5040_s0 + %s4430_s22]]   ;;  %s4433_s4 = smov 8  }
   0x7   :  { %s4497_s29 = sld [smem:[%s5040_s0 + %s4431_s26]]   ;;  %s4434_s10 = smov 9  }
   0x8   :  { %5051 = sst [smem:[#allocation5_spill]] %s4472_s9  ;;  %s4435_s15 = smov 10  }
   0x9   :  { %s4502_s3 = sld [smem:[%s5040_s0 + %s4432_s30]]   ;;  %s4436_s20 = smov 11  }
   0xa   :  { %5052 = sst [smem:[#allocation6_spill]] %s4482_s17  ;;  %s4437_s26 = smov 12  }
   0xb   :  { %5053 = sst [smem:[#allocation7_spill]] %s4487_s21  ;;  %s4438_s1 = smov 13  }
   0xc   :  { %5054 = sst [smem:[#allocation8_spill]] %s4492_s25  ;;  %s4439_s7 = smov 14  }
   0xd   :  { %5055 = sst [smem:[#allocation9_spill]] %s4497_s29  ;;  %s4441_s22 = smov 16  }
   0xe   :  { %s4507_s8 = sld [smem:[%s5040_s0 + %s4433_s4]]   ;;  %s4442_s28 = smov 17  }
   0xf   :  { %s4512_s14 = sld [smem:[%s5040_s0 + %s4434_s10]]  }
  0x10   :  { %s4517_s19 = sld [smem:[%s5040_s0 + %s4435_s15]]   ;;  %s4440_s15 = smov 15  }
  0x11   :  { %s4522_s24 = sld [smem:[%s5040_s0 + %s4436_s20]]  }
  0x12   :  { %s4527_s30 = sld [smem:[%s5040_s0 + %s4437_s26]]  }
  0x13   :  { %s4532_s6 = sld [smem:[%s5040_s0 + %s4438_s1]]  }
  0x14   :  { %s4537_s12 = sld [smem:[%s5040_s0 + %s4439_s7]]   ;;  %s4443_s7 = smov 18  }
  0x15   :  { %s4542_s20 = sld [smem:[%s5040_s0 + %s4440_s15]]   ;;  %s4444_s15 = smov 19  }
  0x16   :  { %s4547_s27 = sld [smem:[%s5040_s0 + %s4441_s22]]   ;;  %s4445_s22 = smov 20  }
  0x17   :  { %s4552_s4 = sld [smem:[%s5040_s0 + %s4442_s28]]   ;;  %s4446_s28 = smov 21  }
  0x18   :  { %s4557_s25 = sld [smem:[%s5040_s0 + %s4443_s7]]   ;;  %s4447_s7 = smov 22  }
  0x19   :  { %s4562_s17 = sld [smem:[%s5040_s0 + %s4444_s15]]   ;;  %s4448_s15 = smov 23  }
  0x1a   :  { %s4567_s29 = sld [smem:[%s5040_s0 + %s4445_s22]]   ;;  %s4449_s22 = smov 24  }
  0x1b   :  { %s4572_s21 = sld [smem:[%s5040_s0 + %s4446_s28]]   ;;  %s4450_s28 = smov 25  }
  0x1c   :  { %5056 = sst [smem:[#allocation10_spill]] %s4547_s27 }
  0x1d   :  { %5057 = sst [smem:[#allocation11_spill]] %s4552_s4 }
  0x1e   :  { %s4577_s27 = sld [smem:[%s5040_s0 + %s4447_s7]]   ;;  %s4451_s7 = smov 26  }
  0x1f   :  { %5058 = sst [smem:[#allocation12_spill]] %s4562_s17 }
  0x20   :  { %s4582_s17 = sld [smem:[%s5040_s0 + %s4448_s15]]   ;;  %s4452_s15 = smov 27  }
  0x21   :  { %5059 = sst [smem:[#allocation13_spill]] %s4572_s21 }
  0x22   :  { %s4587_s9 = sld [smem:[%s5040_s0 + %s4449_s22]]   ;;  %s4453_s22 = smov 28  }
  0x23   :  { %s4592_s21 = sld [smem:[%s5040_s0 + %s4450_s28]]   ;;  %s4454_s28 = smov 29  }
  0x24   :  { %5060 = sst [smem:[#allocation14_spill]] %s4577_s27 }
  0x25   :  { %s4597_s27 = sld [smem:[%s5040_s0 + %s4451_s7]]  }
  0x26   :  { %5061 = sst [smem:[#allocation15_spill]] %s4582_s17 }
  0x27   :  { %s4602_s17 = sld [smem:[%s5040_s0 + %s4452_s15]]  }
  0x28   :  { %5062 = sst [smem:[#allocation16_spill]] %s4587_s9 }
  0x29   :  { %s4607_s9 = sld [smem:[%s5040_s0 + %s4453_s22]]  }
  0x2a   :  { %s4612_s4 = sld [smem:[%s5040_s0 + %s4454_s28]]  }
  0x2b   :  { %v125_v0 = vld [vmem:[%s4507_s8] sm:$0xff]  ;;  %v126_v1 = vld [vmem:[%s4507_s8 + $0x8] sm:$0xff]  ;;  %vm135_vm0 = vcmask 195584  }
  0x2c   :  { %v3978_v2 = vpack.c.bf16 %v126_v1, %v125_v0  ;;  %v123_v3 = vld [vmem:[%s4467_s5] sm:$0xff] }
  0x2d   :  { %64 = vsyncpa [#allocation3], 0  ;;  %v127_v4 = vld [vmem:[%s4507_s8 + $0x10] sm:$0xff]  ;;  %3638 = vmatprep.mubr.msk.f32.mxu0 %vm135_vm0, %v123_v3  ;;  %v124_v5 = vld [vmem:[%s4467_s5 + $0x8] sm:$0xff]  ;;  %vm219_vm1 = vcmask 261120   ;;  %s5063_s0 = sld [smem:[#allocation11_spill]] }
  0x2e   :  { %3979 = vmatprep.subr.bf16.mxu0 %v3978_v2  ;;  %v3321_v6 = vld [vmem:[%s4502_s3] ss:$0 sm:$0xff]  ;;  %v266_v24 = vld [vmem:[%s4517_s19 + $0x8] sm:$0xff]  ;;  %v267_v25 = vld [vmem:[%s4517_s19 + $0x10] sm:$0xff]  ;;  %s5064_s5 = sld [smem:[#allocation5_spill]]  ;;  %vm745_vm2 = vcmask 130048  }
  0x2f   :  { %3981 = vmatpush3.bf16.msra.mxu0 %v3978_v2  ;;  %v265_v23 = vld [vmem:[%s4517_s19] sm:$0xff]  ;;  %v268_v27 = vld [vmem:[%s4517_s19 + $0x18] sm:$0xff]  ;;  %v451_v0 = vld [vmem:[%s4557_s25 + $0x8] sm:$0xff]  ;;  %s5065_s3 = sld [smem:[#allocation12_spill]]  ;;  %s5066_s8 = sld [smem:[#allocation10_spill]]  ;;  %vm3190_vm3 = vcmask 523264  }
  0x30   :  { %3636 = vmatprep.subr.mxu0 %v127_v4  ;;  %v3982_v26 = vpack.c.bf16 %v266_v24, %v265_v23  ;;  %v3986_v28 = vpack.c.bf16 %v268_v27, %v267_v25  ;;  %v3324_v36 = vld [vmem:[%s4527_s30] ss:$0 sm:$0xff]  ;;  %v453_v1 = vld [vmem:[%s4557_s25 + $0x18] sm:$0xff]  ;;  %s5068_s19 = sld [smem:[#allocation16_spill]]  ;;  %s5070_s30 = sld [smem:[#allocation15_spill]] }
  0x31   :  { %v3325_v38 = vld [vmem:[%s4522_s24] ss:$0 sm:$0xff]  ;;  %v3998_v2 = vpack.c.bf16 %v453_v1, %v451_v0  ;;  %s5069_s24 = sld [smem:[#allocation13_spill]] }
  0x32   :  { %3983 = vmatprep.subr.bf16.mxu1 %v3982_v26  ;;  %v3326_v47 = vld [vmem:[%s4512_s14] ss:$0 sm:$0xff]  ;;  %s5067_s14 = sld [smem:[#allocation14_spill]] }
  0x33   :  { %3637 = vmatpush3.msra.mxu0 %v127_v4  ;;  %3985 = vmatpush3.bf16.msra.mxu1 %v3982_v26  ;;  %v450_v3 = vld [vmem:[%s4557_s25] sm:$0xff]  ;;  %v452_v4 = vld [vmem:[%s4557_s25 + $0x10] sm:$0xff] }
  0x34   :  { %3639 = vmatmul.mubr.msk.f32.vlgmr.msra.gmra.mrb[0].mxu0 %vm135_vm0, %v124_v5  ;;  %3987 = vmatprep.subr.bf16.mxu1 %v3986_v28  ;;  %v4000_v5 = vpack.c.bf16 %v452_v4, %v450_v3  ;;  %v3330_v24 = vld [vmem:[%s4532_s6] ss:$0 sm:$0xff] }
  0x37   :  { %3989 = vmatpush3.bf16.msra.mxu1 %v3986_v28 }
  0x38   :  { %3999 = vmatprep.subr.bf16.mxu1 %v3998_v2 }
 0x107   :  { %v3640_v7 = vpop.f32.mrb[0].mxu0 }
 0x108   :  { %v208_v8 = vpop.f32.mrb[1].mxu0  ;;  %v214_v10 = vadd.f32 %v3640_v7, %v3321_v6  ;;  %v457_v7 = vld [vmem:[%s4557_s25 + $0x38] sm:$0xff] }
 0x109   :  { %v209_v9 = vadd.f32 %v3321_v6, %v208_v8  ;;  %v455_v6 = vld [vmem:[%s4557_s25 + $0x28] sm:$0xff] }
 0x10a   :  { %v223_v12 = vsel %vm219_vm1, %v214_v10, 0.0  ;;  %v4002_v8 = vpack.c.bf16 %v457_v7, %v455_v6 }
 0x10b   :  { %v220_v11 = vsel %vm219_vm1, %v209_v9, 0.0 }
 0x10c   :  { %221 = vadd.xlane.f32.xlu0 %v220_v11 }
 0x110   :  { %224 = vadd.xlane.f32.xlu0 %v223_v12  ;;  %v4455_v12 = vmov 0.0  }
 0x199   :  { %v222_v13 = vpop.xlane.xlu0 %221 }
 0x19a   :  { %v227_v14 = vmul.f32 0.03125, %v222_v13 }
 0x19c   :  { %v229_v15 = vsub.f32 %v209_v9, %v227_v14  ;;  %v454_v9 = vld [vmem:[%s4557_s25 + $0x20] sm:$0xff] }
 0x19d   :  { %v225_v16 = vpop.xlane.xlu0 %224 }
 0x19e   :  { %v228_v17 = vmul.f32 0.03125, %v225_v16  ;;  %v231_v18 = vmul.f32 %v229_v15, %v229_v15 }
 0x1a0   :  { %v230_v19 = vsub.f32 %v214_v10, %v228_v17  ;;  %v233_v20 = vsel %vm219_vm1, %v231_v18, 0.0  ;;  %v456_v10 = vld [vmem:[%s4557_s25 + $0x30] sm:$0xff] }
 0x1a1   :  { %234 = vadd.xlane.f32.xlu1 %v233_v20  ;;  %v4004_v11 = vpack.c.bf16 %v456_v10, %v454_v9  ;;  %v3329_v20 = vld [vmem:[%s4537_s12] ss:$0 sm:$0xff] }
 0x1a2   :  { %v232_v21 = vmul.f32 %v230_v19, %v230_v19 }
 0x1a4   :  { %v236_v22 = vsel %vm219_vm1, %v232_v21, 0.0 }
 0x1a5   :  { %237 = vadd.xlane.f32.xlu1 %v236_v22 }
 0x22e   :  { %v235_v29 = vpop.xlane.xlu1 %234 }
 0x22f   :  { %v239_v30 = vmul.f32 0.03125, %v235_v29 }
 0x231   :  { %v241_v31 = vadd.f32 1e-05, %v239_v30 }
 0x232   :  { %v238_v32 = vpop.xlane.xlu1 %237 }
 0x233   :  { %4299 = vrsqrt.f32 %v241_v31  ;;  %v240_v33 = vmul.f32 0.03125, %v238_v32  ;;  %v445_v31 = vld [vmem:[%s4567_s29] sm:$0xff]  ;;  %v446_v32 = vld [vmem:[%s4567_s29 + $0x8] sm:$0xff] }
 0x235   :  { %v242_v34 = vadd.f32 1e-05, %v240_v33  ;;  %v3990_v33 = vpack.c.bf16 %v446_v32, %v445_v31 }
 0x237   :  { %4301 = vrsqrt.f32 %v242_v34  ;;  %3991 = vmatprep.subr.bf16.mxu0 %v3990_v33  ;;  %v447_v34 = vld [vmem:[%s4567_s29 + $0x10] sm:$0xff] }
 0x238   :  { %3993 = vmatpush3.bf16.msra.mxu0 %v3990_v33 }
 0x23d   :  { %v4300_v35 = vpop.eup %4299 }
 0x23e   :  { %v245_v37 = vmul.f32 %v4300_v35, %v229_v15  ;;  %v448_v35 = vld [vmem:[%s4567_s29 + $0x18] sm:$0xff] }
 0x240   :  { %v253_v39 = vmul.f32 %v3324_v36, %v245_v37 }
 0x241   :  { %v4302_v40 = vpop.eup %4301 }
 0x242   :  { %v246_v41 = vmul.f32 %v4302_v40, %v230_v19  ;;  %v261_v42 = vadd.f32 %v3325_v38, %v253_v39 }
 0x244   :  { %v254_v43 = vmul.f32 %v3324_v36, %v246_v41  ;;  %v263_v44 = vmax.f32 %v261_v42, 0.0  ;;  %v3994_v36 = vpack.c.bf16 %v448_v35, %v447_v34  ;;  %v3333_v34 = vld [vmem:[%s5063_s0] ss:$0 sm:$0xff] }
 0x246   :  { %v262_v45 = vadd.f32 %v3325_v38, %v254_v43  ;;  %3649 = vmatprep.mubr.msk.f32.mxu1 %vm219_vm1, %v263_v44  ;;  %3995 = vmatprep.subr.bf16.mxu0 %v3994_v36 }
 0x247   :  { %3997 = vmatpush3.bf16.msra.mxu0 %v3994_v36 }
 0x248   :  { %v264_v46 = vmax.f32 %v262_v45, 0.0 }
 0x24a   :  { %3650 = vmatmul.mubr.msk.f32.vlgmr.msra.gmra.mrb[0].mxu1 %vm219_vm1, %v264_v46 }
 0x24b   :  { %4001 = vmatpush1.bf16.msra.mxu1 %v4000_v5  ;;  %644 = vmatprep.mubr.f32.mxu1 %v4455_v12 }
 0x24c   :  { %4003 = vmatprep.subr.bf16.mxu1 %v4002_v8 }
 0x24f   :  { %4005 = vmatpush1.bf16.msra.mxu1 %v4004_v11 }
 0x31d   :  { %v3651_v48 = vpop.f32.mrb[0].mxu1 }
 0x31e   :  { %v354_v49 = vadd.f32 %v3651_v48, %v3326_v47  ;;  %v348_v50 = vpop.f32.mrb[1].mxu1 }
 0x31f   :  { %v349_v51 = vadd.f32 %v3326_v47, %v348_v50  ;;  %v564_v47 = vlaneseq  ;;  %v458_v50 = vld [vmem:[%s4542_s20] sm:$0x3] }
 0x320   :  { %v362_v52 = vsel %vm219_vm1, %v354_v49, 0.0 }
 0x321   :  { %363 = vadd.xlane.f32.xlu1 %v362_v52  ;;  %v359_v53 = vsel %vm219_vm1, %v349_v51, 0.0  ;;  %v4669_v48 = vshrl.u32 %v564_v47, 7 }
 0x322   :  { %360 = vadd.xlane.f32.xlu0 %v359_v53 }
 0x3ae   :  { %v364_v54 = vpop.xlane.xlu1 %363 }
 0x3af   :  { %v366_v55 = vmul.f32 0.03125, %v364_v54  ;;  %v361_v56 = vpop.xlane.xlu0 %360 }
 0x3b0   :  { %v365_v57 = vmul.f32 0.03125, %v361_v56 }
 0x3b1   :  { %v368_v58 = vsub.f32 %v354_v49, %v366_v55  ;;  %v570_v49 = vsub.s32 1, %v4669_v48 }
 0x3b2   :  { %v367_v59 = vsub.f32 %v349_v51, %v365_v57  ;;  %v566_v51 = vsub.s32 0, %v4669_v48  ;;  %v4679_v57 = vld [vmem:[%s4477_s13 + $0x1] ss:$0 sm:$0xff] }
 0x3b3   :  { %v370_v60 = vmul.f32 %v368_v58, %v368_v58  ;;  %v571_v52 = vrot.slane %v458_v50, %v570_v49 }
 0x3b4   :  { %v369_v61 = vmul.f32 %v367_v59, %v367_v59  ;;  %v567_v54 = vrot.slane %v458_v50, %v566_v51 }
 0x3b5   :  { %v374_v62 = vsel %vm219_vm1, %v370_v60, 0.0  ;;  %v4685_v60 = vld [vmem:[%s4477_s13 + $0x2] ss:$0 sm:$0xff] }
 0x3b6   :  { %375 = vadd.xlane.f32.xlu1 %v374_v62  ;;  %v371_v63 = vsel %vm219_vm1, %v369_v61, 0.0  ;;  %v4688_v61 = vld [vmem:[%s4477_s13 + $0x3] ss:$0 sm:$0xff] }
 0x3b7   :  { %372 = vadd.xlane.f32.xlu0 %v371_v63 }
 0x443   :  { %v376_v13 = vpop.xlane.xlu1 %375 }
 0x444   :  { %v378_v14 = vmul.f32 0.03125, %v376_v13  ;;  %v373_v15 = vpop.xlane.xlu0 %372 }
 0x445   :  { %v377_v16 = vmul.f32 0.03125, %v373_v15 }
 0x446   :  { %v380_v17 = vadd.f32 1e-05, %v378_v14 }
 0x447   :  { %v379_v18 = vadd.f32 1e-05, %v377_v16 }
 0x448   :  { %4303 = vrsqrt.f32 %v380_v17 }
 0x449   :  { %4305 = vrsqrt.f32 %v379_v18 }
 0x452   :  { %v4304_v19 = vpop.eup %4303 }
 0x453   :  { %v4306_v21 = vpop.eup %4305  ;;  %v384_v22 = vmul.f32 %v4304_v19, %v368_v58  ;;  %v4682_v58 = vld [vmem:[%s4477_s13] ss:$0 sm:$0xff] }
 0x454   :  { %v383_v23 = vmul.f32 %v4306_v21, %v367_v59 }
 0x455   :  { %v392_v25 = vmul.f32 %v3329_v20, %v384_v22 }
 0x456   :  { %v391_v26 = vmul.f32 %v3329_v20, %v383_v23  ;;  %v3331_v23 = vld [vmem:[%s4597_s27] ss:$0 sm:$0xff] }
 0x457   :  { %v4648_v27 = vadd.f32 %v3330_v24, %v392_v25 }
 0x458   :  { %v4650_v28 = vadd.f32 %v3330_v24, %v391_v26 }
 0x459   :  { %v406_v29 = vsel %vm219_vm1, %v4648_v27, 0.0 }
 0x45a   :  { %407 = vadd.xlane.f32.xlu1 %v406_v29  ;;  %3336 = vmatmul.mubr.msk.f32.vlgmr.msra.gmra.mrb[2].mxu1 %vm219_vm1, %v4650_v28  ;;  %v403_v30 = vsel %vm219_vm1, %v4650_v28, 0.0  ;;  %v3332_v29 = vld [vmem:[%s4592_s21] ss:$0 sm:$0xff] }
 0x45b   :  { %404 = vadd.xlane.f32.xlu0 %v403_v30  ;;  %650 = vmatprep.mubr.f32.mxu1 %v4455_v12 }
 0x45e   :  { %3337 = vmatmul.mubr.msk.f32.gmra.mrb[4].mxu1 %vm219_vm1, %v4648_v27 }
 0x4e7   :  { %v408_v37 = vpop.xlane.xlu1 %407 }
 0x4e8   :  { %v410_v38 = vmul.f32 0.03125, %v408_v37  ;;  %v405_v39 = vpop.xlane.xlu0 %404 }
 0x4e9   :  { %v409_v40 = vmul.f32 0.03125, %v405_v39 }
 0x4ea   :  { %v412_v41 = vsub.f32 %v4648_v27, %v410_v38 }
 0x4eb   :  { %v411_v42 = vsub.f32 %v4650_v28, %v409_v40 }
 0x4ec   :  { %v414_v43 = vmul.f32 %v412_v41, %v412_v41 }
 0x4ed   :  { %v413_v44 = vmul.f32 %v411_v42, %v411_v42 }
 0x4ee   :  { %v418_v45 = vsel %vm219_vm1, %v414_v43, 0.0 }
 0x4ef   :  { %419 = vadd.xlane.f32.xlu1 %v418_v45  ;;  %v415_v46 = vsel %vm219_vm1, %v413_v44, 0.0  ;;  %v4724_v45 = vld [vmem:[%s5064_s5 + $0x8] sm:$0xff] }
 0x4f0   :  { %416 = vadd.xlane.f32.xlu0 %v415_v46  ;;  %v4727_v46 = vld [vmem:[%s5064_s5] sm:$0xff] }
 0x52d   :  { %v646_v53 = vpop.f32.mrb[2].mxu1 }
 0x52e   :  { %v648_v55 = vpop.f32.mrb[3].mxu1  ;;  %v647_v62 = vadd.f32 %v646_v53, %v567_v54 }
 0x52f   :  { %v649_v56 = vadd.f32 %v648_v55, %v571_v52 }
 0x531   :  { %v652_v59 = vpop.f32.mrb[4].mxu1  ;;  %v877_v2 = vmul.f32 %v4679_v57, %v649_v56  ;;  %v768_v4 = vmul.f32 %v4682_v58, %v649_v56  ;;  %v1148_v5 = vmul.f32 %v4685_v60, %v649_v56  ;;  %v1340_v6 = vmul.f32 %v4688_v61, %v649_v56 }
 0x532   :  { %v653_v63 = vadd.f32 %v652_v59, %v567_v54  ;;  %v654_v0 = vpop.f32.mrb[5].mxu1 }
 0x533   :  { %v655_v1 = vadd.f32 %v654_v0, %v571_v52 }
 0x534   :  { %v4691_v3 = vpack.c.bf16 %v653_v63, %v647_v62 }
 0x535   :  { %v878_v7 = vmul.f32 %v4679_v57, %v655_v1  ;;  %v769_v8 = vmul.f32 %v4682_v58, %v655_v1  ;;  %v1149_v9 = vmul.f32 %v4685_v60, %v655_v1  ;;  %v1341_v10 = vmul.f32 %v4688_v61, %v655_v1 }
 0x536   :  { %4007 = vmatprep.subr.bf16.mxu0 %v4691_v3  ;;  %4011 = vmatprep.subr.bf16.mxu1 %v4691_v3 }
 0x537   :  { %4013 = vmatpush3.bf16.xpose.msra.mxu1 %v4691_v3  ;;  %v4014_v11 = vpack.c.bf16 %v878_v7, %v877_v2  ;;  %v4018_v13 = vpack.c.bf16 %v769_v8, %v768_v4  ;;  %v4703_v14 = vpack.c.bf16 %v1149_v9, %v1148_v5  ;;  %v4705_v15 = vpack.c.bf16 %v1341_v10, %v1340_v6 }
 0x539   :  { %4015 = vmatprep.subr.bf16.mxu1 %v4014_v11 }
 0x57c   :  { %v420_v16 = vpop.xlane.xlu1 %419 }
 0x57d   :  { %v422_v17 = vmul.f32 0.03125, %v420_v16  ;;  %v417_v18 = vpop.xlane.xlu0 %416 }
 0x57e   :  { %v421_v19 = vmul.f32 0.03125, %v417_v18 }
 0x57f   :  { %v424_v20 = vadd.f32 1e-05, %v422_v17 }
 0x580   :  { %v423_v21 = vadd.f32 1e-05, %v421_v19 }
 0x581   :  { %4307 = vrsqrt.f32 %v424_v20 }
 0x582   :  { %4309 = vrsqrt.f32 %v423_v21 }
 0x58b   :  { %v4308_v22 = vpop.eup %4307 }
 0x58c   :  { %v4310_v24 = vpop.eup %4309  ;;  %v428_v25 = vmul.f32 %v4308_v22, %v412_v41 }
 0x58d   :  { %v427_v26 = vmul.f32 %v4310_v24, %v411_v42 }
 0x58e   :  { %v436_v30 = vmul.f32 %v3331_v23, %v428_v25 }
 0x58f   :  { %v435_v31 = vmul.f32 %v3331_v23, %v427_v26 }
 0x590   :  { %v444_v33 = vadd.f32 %v3332_v29, %v436_v30 }
 0x591   :  { %v443_v32 = vadd.f32 %v3332_v29, %v435_v31 }
 0x593   :  { %3660 = vmatprep.mubr.msk.f32.mxu0 %vm219_vm1, %v443_v32 }
 0x594   :  { %3661 = vmatmul.mubr.msk.f32.vlgmr.msra.gmra.mrb[2].mxu0 %vm219_vm1, %v444_v33 }
 0x595   :  { %4009 = vmatpush3.bf16.xpose.msra.mxu0 %v4691_v3 }
 0x596   :  { %4019 = vmatprep.subr.bf16.mxu0 %v4018_v13 }
 0x667   :  { %v3662_v35 = vpop.f32.mrb[2].mxu0 }
 0x668   :  { %v560_v36 = vadd.f32 %v3662_v35, %v3333_v34  ;;  %v554_v37 = vpop.f32.mrb[3].mxu0 }
 0x669   :  { %v555_v38 = vadd.f32 %v3333_v34, %v554_v37 }
 0x66a   :  { %v4713_v39 = vmul.f32 0.35355338, %v560_v36 }
 0x66b   :  { %v659_v40 = vmul.f32 0.35355338, %v555_v38 }
 0x66c   :  { %v779_v43 = vmul.f32 %v4679_v57, %v4713_v39  ;;  %v669_v44 = vmul.f32 %v4682_v58, %v4713_v39  ;;  %v1050_v23 = vmul.f32 %v4685_v60, %v4713_v39  ;;  %v1242_v25 = vmul.f32 %v4688_v61, %v4713_v39 }
 0x66d   :  { %v668_v41 = vmul.f32 %v4682_v58, %v659_v40  ;;  %v778_v42 = vmul.f32 %v4679_v57, %v659_v40  ;;  %v1049_v22 = vmul.f32 %v4685_v60, %v659_v40  ;;  %v1241_v24 = vmul.f32 %v4688_v61, %v659_v40 }
 0x66f   :  { %3667 = vmatprep.mubr.f32.mxu0 %v668_v41  ;;  %3674 = vmatprep.mubr.f32.mxu1 %v778_v42 }
 0x670   :  { %3668 = vmatmul.mubr.f32.vlgmr.msra.gmra.mrb[4].mxu0 %v669_v44  ;;  %3675 = vmatmul.mubr.f32.vlgmr.msra.gmra.mrb[6].mxu1 %v779_v43 }
 0x671   :  { %4017 = vmatpush3.bf16.msra.mxu1 %v4014_v11  ;;  %4021 = vmatpush3.bf16.msra.mxu0 %v4018_v13 }
 0x672   :  { %4023 = vmatprep.subr.bf16.mxu1 %v4691_v3  ;;  %4027 = vmatprep.subr.bf16.mxu0 %v4703_v14 }
 0x743   :  { %v3669_v47 = vpop.f32.mrb[4].mxu0  ;;  %v3676_v50 = vpop.f32.mrb[6].mxu1 }
 0x744   :  { %v852_v52 = vadd.f32 %v3676_v50, %v4724_v45  ;;  %v736_v53 = vpop.f32.mrb[5].mxu0  ;;  %v846_v54 = vpop.f32.mrb[7].mxu1  ;;  %v742_v7 = vadd.f32 %v3669_v47, %v4724_v45 }
 0x745   :  { %v847_v55 = vadd.f32 %v846_v54, %v4727_v46  ;;  %v737_v9 = vadd.f32 %v736_v53, %v4727_v46 }
 0x746   :  { %v858_v56 = vsel %vm745_vm2, %v852_v52, -inf  ;;  %v749_v11 = vsel %vm745_vm2, %v742_v7, -inf }
 0x747   :  { %859 = vmax.xlane.f32.xlu1 %v858_v56  ;;  %v855_v59 = vsel %vm745_vm2, %v847_v55, -inf  ;;  %v746_v13 = vsel %vm745_vm2, %v737_v9, -inf }
 0x748   :  { %856 = vmax.xlane.f32.xlu0 %v855_v59 }
 0x7d4   :  { %v860_v62 = vpop.xlane.xlu1 %859 }
 0x7d5   :  { %v862_v63 = vsub.f32 %v852_v52, %v860_v62  ;;  %v857_v0 = vpop.xlane.xlu0 %856 }
 0x7d6   :  { %v861_v1 = vsub.f32 %v847_v55, %v857_v0 }
 0x7d7   :  { %v865_v2 = vmul.f32 1.442695, %v862_v63 }
 0x7d8   :  { %v863_v4 = vmul.f32 1.442695, %v861_v1 }
 0x7d9   :  { %4311 = vpow2.f32 %v865_v2 }
 0x7da   :  { %4313 = vpow2.f32 %v863_v4 }
 0x7e3   :  { %v4312_v5 = vpop.eup %4311 }
 0x7e4   :  { %v4314_v6 = vpop.eup %4313  ;;  %v870_v8 = vsel %vm745_vm2, %v4312_v5, 0.0 }
 0x7e5   :  { %871 = vadd.xlane.f32.xlu1 %v870_v8  ;;  %v867_v10 = vsel %vm745_vm2, %v4314_v6, 0.0 }
 0x7e6   :  { %868 = vadd.xlane.f32.xlu0 %v867_v10 }
 0x7e9   :  { %750 = vmax.xlane.f32.xlu1 %v749_v11 }
 0x7ea   :  { %747 = vmax.xlane.f32.xlu0 %v746_v13 }
 0x872   :  { %v872_v16 = vpop.xlane.xlu1 %871 }
 0x873   :  { %4315 = vrcp.f32 %v872_v16  ;;  %v869_v17 = vpop.xlane.xlu0 %868 }
 0x874   :  { %4317 = vrcp.f32 %v869_v17 }
 0x876   :  { %v751_v26 = vpop.xlane.xlu1 %750 }
 0x877   :  { %v748_v29 = vpop.xlane.xlu0 %747  ;;  %v753_v32 = vsub.f32 %v742_v7, %v751_v26 }
 0x878   :  { %v752_v33 = vsub.f32 %v737_v9, %v748_v29 }
 0x879   :  { %v756_v34 = vmul.f32 1.442695, %v753_v32 }
 0x87a   :  { %v754_v35 = vmul.f32 1.442695, %v752_v33 }
 0x87b   :  { %4319 = vpow2.f32 %v756_v34 }
 0x87c   :  { %4321 = vpow2.f32 %v754_v35  ;;  %v459_v35 = vld [vmem:[%s5065_s3] sm:$0xff] }
 0x87d   :  { %v4316_v18 = vpop.eup %4315 }
 0x87e   :  { %v4318_v19 = vpop.eup %4317  ;;  %v876_v21 = vmul.f32 %v4316_v18, %v4312_v5 }
 0x87f   :  { %v875_v20 = vmul.f32 %v4318_v19, %v4314_v6 }
 0x881   :  { %3681 = vmatprep.mubr.msk.f32.mxu1 %vm745_vm2, %v875_v20 }
 0x882   :  { %3682 = vmatmul.mubr.msk.f32.vlgmr.msra.gmra.mrb[8].mxu1 %vm745_vm2, %v876_v21 }
 0x883   :  { %4025 = vmatpush3.bf16.xpose.msra.mxu1 %v4691_v3  ;;  %3695 = vmatprep.mubr.f32.mxu1 %v1049_v22 }
 0x884   :  { %4031 = vmatprep.subr.bf16.mxu1 %v4691_v3 }
 0x885   :  { %v4320_v50 = vpop.eup %4319 }
 0x886   :  { %v4322_v53 = vpop.eup %4321  ;;  %v761_v54 = vsel %vm745_vm2, %v4320_v50, 0.0 }
 0x887   :  { %v758_v55 = vsel %vm745_vm2, %v4322_v53, 0.0 }
 0x88a   :  { %3696 = vmatmul.mubr.f32.vlgmr.msra.gmra.mrb[10].mxu1 %v1050_v23 }
 0x88b   :  { %4033 = vmatpush3.bf16.xpose.msra.mxu1 %v4691_v3  ;;  %3709 = vmatprep.mubr.f32.mxu1 %v1241_v24 }
 0x892   :  { %3710 = vmatmul.mubr.f32.vlgmr.msra.gmra.mrb[12].mxu1 %v1242_v25 }
 0x955   :  { %v4750_v30 = vpop.f32.mrb[8].mxu1 }
 0x956   :  { %v4752_v31 = vpop.f32.mrb[9].mxu1 }
 0x95d   :  { %v3697_v36 = vpop.f32.mrb[10].mxu1 }
 0x95e   :  { %v1123_v37 = vadd.f32 %v3697_v36, %v4724_v45  ;;  %v1117_v38 = vpop.f32.mrb[11].mxu1  ;;  %v460_v36 = vld [vmem:[%s5065_s3 + $0x8] sm:$0xff] }
 0x95f   :  { %v1118_v3 = vadd.f32 %v1117_v38, %v4727_v46 }
 0x960   :  { %v1129_v39 = vsel %vm745_vm2, %v1123_v37, -inf }
 0x961   :  { %1130 = vmax.xlane.f32.xlu1 %v1129_v39  ;;  %v1126_v40 = vsel %vm745_vm2, %v1118_v3, -inf }
 0x962   :  { %1127 = vmax.xlane.f32.xlu0 %v1126_v40  ;;  %v461_v40 = vld [vmem:[%s5065_s3 + $0x10] sm:$0xff] }
 0x965   :  { %v3711_v41 = vpop.f32.mrb[12].mxu1 }
 0x966   :  { %v1315_v42 = vadd.f32 %v3711_v41, %v4724_v45  ;;  %v1309_v43 = vpop.f32.mrb[13].mxu1  ;;  %v462_v41 = vld [vmem:[%s5065_s3 + $0x18] sm:$0xff] }
 0x967   :  { %v1310_v44 = vadd.f32 %v1309_v43, %v4727_v46 }
 0x968   :  { %v1321_v47 = vsel %vm745_vm2, %v1315_v42, -inf }
 0x969   :  { %1322 = vmax.xlane.f32.xlu1 %v1321_v47  ;;  %v1318_v52 = vsel %vm745_vm2, %v1310_v44, -inf  ;;  %v4042_v47 = vpack.c.bf16 %v462_v41, %v461_v40  ;;  %v1654_v41 = vld [vmem:[%s5068_s19] sm:$0xff] }
 0x96a   :  { %1319 = vmax.xlane.f32.xlu0 %v1318_v52  ;;  %v464_v52 = vld [vmem:[%s5065_s3 + $0x28] sm:$0xff] }
 0x96d   :  { %762 = vadd.xlane.f32.xlu1 %v761_v54  ;;  %v466_v54 = vld [vmem:[%s5065_s3 + $0x38] sm:$0xff] }
 0x96e   :  { %759 = vadd.xlane.f32.xlu0 %v758_v55 }
 0x9ee   :  { %v1131_v56 = vpop.xlane.xlu1 %1130 }
 0x9ef   :  { %v1133_v59 = vsub.f32 %v1123_v37, %v1131_v56  ;;  %v1128_v62 = vpop.xlane.xlu0 %1127  ;;  %v467_v56 = vld [vmem:[%s5065_s3 + $0x40] sm:$0xff] }
 0x9f0   :  { %v1132_v63 = vsub.f32 %v1118_v3, %v1128_v62  ;;  %v4038_v3 = vpack.c.bf16 %v460_v36, %v459_v35 }
 0x9f1   :  { %v1136_v0 = vmul.f32 1.442695, %v1133_v59  ;;  %v468_v59 = vld [vmem:[%s5065_s3 + $0x48] sm:$0xff] }
 0x9f2   :  { %v1134_v1 = vmul.f32 1.442695, %v1132_v63  ;;  %v4054_v62 = vpack.c.bf16 %v468_v59, %v467_v56  ;;  %v469_v63 = vld [vmem:[%s5065_s3 + $0x50] sm:$0xff] }
 0x9f3   :  { %4323 = vpow2.f32 %v1136_v0  ;;  %v470_v0 = vld [vmem:[%s5065_s3 + $0x58] sm:$0xff] }
 0x9f4   :  { %4325 = vpow2.f32 %v1134_v1  ;;  %v4058_v1 = vpack.c.bf16 %v470_v0, %v469_v63  ;;  %v3355_v63 = vld [vmem:[%s4602_s17] ss:$0 sm:$0xff] }
 0x9f6   :  { %v1323_v2 = vpop.xlane.xlu1 %1322 }
 0x9f7   :  { %v1325_v4 = vsub.f32 %v1315_v42, %v1323_v2  ;;  %v1320_v5 = vpop.xlane.xlu0 %1319  ;;  %v471_v2 = vld [vmem:[%s5065_s3 + $0x60] sm:$0xff] }
 0x9f8   :  { %v1324_v6 = vsub.f32 %v1310_v44, %v1320_v5 }
 0x9f9   :  { %v1328_v7 = vmul.f32 1.442695, %v1325_v4  ;;  %v472_v4 = vld [vmem:[%s5065_s3 + $0x68] sm:$0xff] }
 0x9fa   :  { %v1326_v8 = vmul.f32 1.442695, %v1324_v6  ;;  %v763_v9 = vpop.xlane.xlu1 %762  ;;  %v4062_v5 = vpack.c.bf16 %v472_v4, %v471_v2  ;;  %v473_v6 = vld [vmem:[%s5065_s3 + $0x70] sm:$0xff]  ;;  %v1657_v4 = vld [vmem:[%s5068_s19 + $0x18] sm:$0xff] }
 0x9fb   :  { %4327 = vpow2.f32 %v1328_v7  ;;  %v760_v10 = vpop.xlane.xlu0 %759  ;;  %v474_v7 = vld [vmem:[%s5065_s3 + $0x78] sm:$0xff]  ;;  %v1656_v2 = vld [vmem:[%s5068_s19 + $0x10] sm:$0xff] }
 0x9fc   :  { %4329 = vpow2.f32 %v1326_v8  ;;  %v4066_v8 = vpack.c.bf16 %v474_v7, %v473_v6  ;;  %v4082_v7 = vpack.c.bf16 %v1657_v4, %v1656_v2 }
 0x9fd   :  { %v4324_v11 = vpop.eup %4323  ;;  %4331 = vrcp.f32 %v763_v9 }
 0x9fe   :  { %v4326_v13 = vpop.eup %4325  ;;  %4333 = vrcp.f32 %v760_v10  ;;  %v1141_v16 = vsel %vm745_vm2, %v4324_v11, 0.0 }
 0x9ff   :  { %1142 = vadd.xlane.f32.xlu1 %v1141_v16  ;;  %v1138_v17 = vsel %vm745_vm2, %v4326_v13, 0.0  ;;  %v3353_v16 = vld [vmem:[%s5066_s8] ss:$0 sm:$0xff] }
 0xa00   :  { %1139 = vadd.xlane.f32.xlu0 %v1138_v17 }
 0xa05   :  { %v4328_v18 = vpop.eup %4327 }
 0xa06   :  { %v4330_v19 = vpop.eup %4329  ;;  %v1333_v20 = vsel %vm745_vm2, %v4328_v18, 0.0 }
 0xa07   :  { %v4332_v21 = vpop.eup %4331  ;;  %1334 = vadd.xlane.f32.xlu1 %v1333_v20  ;;  %v1330_v22 = vsel %vm745_vm2, %v4330_v19, 0.0 }
 0xa08   :  { %v4334_v23 = vpop.eup %4333  ;;  %1331 = vadd.xlane.f32.xlu0 %v1330_v22  ;;  %v767_v25 = vmul.f32 %v4332_v21, %v4320_v50  ;;  %v463_v50 = vld [vmem:[%s5065_s3 + $0x20] sm:$0xff] }
 0xa09   :  { %v766_v24 = vmul.f32 %v4334_v23, %v4322_v53  ;;  %v465_v53 = vld [vmem:[%s5065_s3 + $0x30] sm:$0xff] }
 0xa0a   :  { %v4050_v55 = vpack.c.bf16 %v466_v54, %v465_v53 }
 0xa0b   :  { %3688 = vmatprep.mubr.msk.f32.mxu0 %vm745_vm2, %v766_v24 }
 0xa0c   :  { %3689 = vmatmul.mubr.msk.f32.vlgmr.msra.gmra.mrb[6].mxu0 %vm745_vm2, %v767_v25 }
 0xa0d   :  { %4029 = vmatpush3.bf16.msra.mxu0 %v4703_v14 }
 0xa0e   :  { %4035 = vmatprep.subr.bf16.mxu0 %v4705_v15 }
 0xa8c   :  { %v1143_v26 = vpop.xlane.xlu1 %1142 }
 0xa8d   :  { %4335 = vrcp.f32 %v1143_v26  ;;  %v1140_v29 = vpop.xlane.xlu0 %1139 }
 0xa8e   :  { %4337 = vrcp.f32 %v1140_v29 }
 0xa94   :  { %v1335_v32 = vpop.xlane.xlu1 %1334 }
 0xa95   :  { %4339 = vrcp.f32 %v1335_v32  ;;  %v1332_v33 = vpop.xlane.xlu0 %1331 }
 0xa96   :  { %4341 = vrcp.f32 %v1332_v33 }
 0xa97   :  { %v4336_v34 = vpop.eup %4335 }
 0xa98   :  { %v4338_v37 = vpop.eup %4337  ;;  %v1147_v14 = vmul.f32 %v4336_v34, %v4324_v11 }
 0xa99   :  { %v1146_v38 = vmul.f32 %v4338_v37, %v4326_v13  ;;  %v1552_v37 = vld [vmem:[%s5067_s14] sm:$0xff] }
 0xa9b   :  { %3702 = vmatprep.mubr.msk.f32.mxu0 %vm745_vm2, %v1146_v38  ;;  %v1553_v38 = vld [vmem:[%s5067_s14 + $0x8] sm:$0xff] }
 0xa9c   :  { %3703 = vmatmul.mubr.msk.f32.vlgmr.msra.gmra.mrb[6].mxu0 %vm745_vm2, %v1147_v14  ;;  %v1554_v14 = vld [vmem:[%s5067_s14 + $0x10] sm:$0xff] }
 0xa9d   :  { %4037 = vmatpush3.bf16.msra.mxu0 %v4705_v15  ;;  %v4046_v15 = vpack.c.bf16 %v464_v52, %v463_v50 }
 0xa9e   :  { %4039 = vmatprep.subr.bf16.mxu0 %v4038_v3 }
 0xa9f   :  { %v4340_v39 = vpop.eup %4339 }
 0xaa0   :  { %v4342_v42 = vpop.eup %4341  ;;  %v1339_v44 = vmul.f32 %v4340_v39, %v4328_v18  ;;  %v1555_v39 = vld [vmem:[%s5067_s14 + $0x18] sm:$0xff] }
 0xaa1   :  { %v1338_v43 = vmul.f32 %v4342_v42, %v4330_v19  ;;  %v4074_v40 = vpack.c.bf16 %v1555_v39, %v1554_v14  ;;  %v1655_v42 = vld [vmem:[%s5068_s19 + $0x8] sm:$0xff] }
 0xaa3   :  { %3716 = vmatprep.mubr.msk.f32.mxu0 %vm745_vm2, %v1338_v43  ;;  %v4078_v43 = vpack.c.bf16 %v1655_v42, %v1654_v41 }
 0xaa4   :  { %3717 = vmatmul.mubr.msk.f32.vlgmr.msra.gmra.mrb[6].mxu0 %vm745_vm2, %v1339_v44 }
 0xaa5   :  { %4041 = vmatpush3.bf16.msra.mxu0 %v4038_v3  ;;  %v4070_v3 = vpack.c.bf16 %v1553_v38, %v1552_v37 }
 0xaa6   :  { %4043 = vmatprep.subr.bf16.mxu0 %v4042_v47 }
 0xaa7   :  { %4071 = vmatprep.subr.bf16.mxu1 %v4070_v3 }
 0xaa8   :  { %4073 = vmatpush3.bf16.msra.mxu1 %v4070_v3 }
 0xaa9   :  { %4045 = vmatpush3.bf16.msra.mxu0 %v4042_v47  ;;  %4075 = vmatprep.subr.bf16.mxu1 %v4074_v40 }
 0xaaa   :  { %4047 = vmatprep.subr.bf16.mxu0 %v4046_v15 }
 0xaac   :  { %4077 = vmatpush3.bf16.msra.mxu1 %v4074_v40 }
 0xaad   :  { %4049 = vmatpush3.bf16.msra.mxu0 %v4046_v15  ;;  %4079 = vmatprep.subr.bf16.mxu1 %v4078_v43 }
 0xaae   :  { %4051 = vmatprep.subr.bf16.mxu0 %v4050_v55 }
 0xab1   :  { %4053 = vmatpush3.bf16.msra.mxu0 %v4050_v55  ;;  %v3354_v55 = vld [vmem:[%s4607_s9] ss:$0 sm:$0xff] }
 0xab2   :  { %4055 = vmatprep.subr.bf16.mxu0 %v4054_v62 }
 0xab5   :  { %4057 = vmatpush3.bf16.msra.mxu0 %v4054_v62 }
 0xab6   :  { %4059 = vmatprep.subr.bf16.mxu0 %v4058_v1 }
 0xab9   :  { %4061 = vmatpush3.bf16.msra.mxu0 %v4058_v1 }
 0xaba   :  { %4063 = vmatprep.subr.bf16.mxu0 %v4062_v5 }
 0xabd   :  { %4065 = vmatpush3.bf16.msra.mxu0 %v4062_v5 }
 0xabe   :  { %4067 = vmatprep.subr.bf16.mxu0 %v4066_v8 }
 0xac1   :  { %4069 = vmatpush3.bf16.msra.mxu0 %v4066_v8  ;;  %v1658_v8 = vld [vmem:[%s5068_s19 + $0x20] sm:$0xff] }
 0xb77   :  { %v3718_v9 = vpop.f32.mrb[6].mxu0 }
 0xb78   :  { %v4254_v10 = vadd.f32 %v3718_v9, %v4750_v30  ;;  %v1414_v11 = vpop.f32.mrb[7].mxu0  ;;  %v1659_v9 = vld [vmem:[%s5068_s19 + $0x28] sm:$0xff] }
 0xb79   :  { %v4255_v13 = vadd.f32 %v1414_v11, %v4752_v31  ;;  %v1660_v11 = vld [vmem:[%s5068_s19 + $0x30] sm:$0xff] }
 0xb7b   :  { %3751 = vmatprep.mubr.f32.mxu0 %v4255_v13  ;;  %v1661_v13 = vld [vmem:[%s5068_s19 + $0x38] sm:$0xff] }
 0xb7c   :  { %3752 = vmatmul.mubr.f32.vlgmr.msra.gmra.mrb[8].mxu0 %v4254_v10  ;;  %v4086_v10 = vpack.c.bf16 %v1659_v9, %v1658_v8  ;;  %v3364_v8 = vld [vmem:[%s4567_s29 + $0x20] sm:$0xff]  ;;  %v3365_v9 = vld [vmem:[%s4567_s29 + $0x28] sm:$0xff] }
 0xc4f   :  { %v3753_v17 = vpop.f32.mrb[8].mxu0 }
 0xc50   :  { %v1503_v18 = vadd.f32 %v3753_v17, %v3353_v16  ;;  %v1497_v19 = vpop.f32.mrb[9].mxu0  ;;  %v1662_v17 = vld [vmem:[%s5068_s19 + $0x40] sm:$0xff] }
 0xc51   :  { %v1498_v20 = vadd.f32 %v3353_v16, %v1497_v19  ;;  %v4090_v16 = vpack.c.bf16 %v1661_v13, %v1660_v11  ;;  %v3366_v11 = vld [vmem:[%s4567_s29 + $0x30] sm:$0xff]  ;;  %v3367_v13 = vld [vmem:[%s4567_s29 + $0x38] sm:$0xff] }
 0xc52   :  { %v4797_v21 = vadd.f32 %v1503_v18, %v4648_v27  ;;  %v1663_v18 = vld [vmem:[%s5068_s19 + $0x48] sm:$0xff] }
 0xc53   :  { %v4800_v22 = vadd.f32 %v1498_v20, %v4650_v28  ;;  %v4094_v19 = vpack.c.bf16 %v1663_v18, %v1662_v17  ;;  %v1664_v20 = vld [vmem:[%s5068_s19 + $0x50] sm:$0xff]  ;;  %v3370_v17 = vld [vmem:[%s4557_s25 + $0x48] sm:$0xff]  ;;  %v3372_v18 = vld [vmem:[%s4557_s25 + $0x58] sm:$0xff] }
 0xc54   :  { %v1513_v23 = vsel %vm219_vm1, %v4797_v21, 0.0 }
 0xc55   :  { %1514 = vadd.xlane.f32.xlu1 %v1513_v23  ;;  %v1510_v30 = vsel %vm219_vm1, %v4800_v22, 0.0  ;;  %v1665_v23 = vld [vmem:[%s5068_s19 + $0x58] sm:$0xff] }
 0xc56   :  { %1511 = vadd.xlane.f32.xlu0 %v1510_v30  ;;  %v4098_v30 = vpack.c.bf16 %v1665_v23, %v1664_v20 }
 0xce2   :  { %v1515_v31 = vpop.xlane.xlu1 %1514 }
 0xce3   :  { %v1517_v24 = vmul.f32 0.03125, %v1515_v31  ;;  %v1512_v25 = vpop.xlane.xlu0 %1511  ;;  %v1666_v31 = vld [vmem:[%s5068_s19 + $0x60] sm:$0xff] }
 0xce4   :  { %v1516_v26 = vmul.f32 0.03125, %v1512_v25 }
 0xce5   :  { %v1519_v29 = vsub.f32 %v4797_v21, %v1517_v24  ;;  %v1667_v24 = vld [vmem:[%s5068_s19 + $0x68] sm:$0xff] }
 0xce6   :  { %v1518_v32 = vsub.f32 %v4800_v22, %v1516_v26  ;;  %v4102_v25 = vpack.c.bf16 %v1667_v24, %v1666_v31  ;;  %v1668_v26 = vld [vmem:[%s5068_s19 + $0x70] sm:$0xff] }
 0xce7   :  { %v1521_v33 = vmul.f32 %v1519_v29, %v1519_v29 }
 0xce8   :  { %v1520_v34 = vmul.f32 %v1518_v32, %v1518_v32 }
 0xce9   :  { %v1525_v35 = vsel %vm219_vm1, %v1521_v33, 0.0  ;;  %v3356_v33 = vld [vmem:[%s5069_s24] ss:$0 sm:$0xff] }
 0xcea   :  { %1526 = vadd.xlane.f32.xlu1 %v1525_v35  ;;  %v1522_v36 = vsel %vm219_vm1, %v1520_v34, 0.0 }
 0xceb   :  { %1523 = vadd.xlane.f32.xlu0 %v1522_v36 }
 0xd77   :  { %v1527_v44 = vpop.xlane.xlu1 %1526 }
 0xd78   :  { %v1529_v47 = vmul.f32 0.03125, %v1527_v44  ;;  %v1524_v50 = vpop.xlane.xlu0 %1523 }
 0xd79   :  { %v1528_v52 = vmul.f32 0.03125, %v1524_v50  ;;  %v3359_v50 = vld [vmem:[%s5070_s30] ss:$0 sm:$0xff] }
 0xd7a   :  { %v1531_v15 = vadd.f32 1e-05, %v1529_v47 }
 0xd7b   :  { %v1530_v53 = vadd.f32 1e-05, %v1528_v52 }
 0xd7c   :  { %4343 = vrsqrt.f32 %v1531_v15 }
 0xd7d   :  { %4345 = vrsqrt.f32 %v1530_v53 }
 0xd86   :  { %v4344_v54 = vpop.eup %4343 }
 0xd87   :  { %v4346_v56 = vpop.eup %4345  ;;  %v1535_v59 = vmul.f32 %v4344_v54, %v1519_v29  ;;  %v1669_v29 = vld [vmem:[%s5068_s19 + $0x78] sm:$0xff] }
 0xd88   :  { %v1534_v62 = vmul.f32 %v4346_v56, %v1518_v32  ;;  %v4106_v32 = vpack.c.bf16 %v1669_v29, %v1668_v26  ;;  %v3362_v29 = vld [vmem:[%s4597_s27 + $0x1] ss:$0 sm:$0xff] }
 0xd89   :  { %v1543_v0 = vmul.f32 %v3354_v55, %v1535_v59 }
 0xd8a   :  { %v1542_v1 = vmul.f32 %v3354_v55, %v1534_v62 }
 0xd8b   :  { %v1551_v6 = vadd.f32 %v3355_v63, %v1543_v0 }
 0xd8c   :  { %v1550_v5 = vadd.f32 %v3355_v63, %v1542_v1 }
 0xd8e   :  { %3762 = vmatprep.mubr.msk.f32.mxu1 %vm219_vm1, %v1550_v5 }
 0xd8f   :  { %3763 = vmatmul.mubr.msk.f32.vlgmr.msra.gmra.mrb[14].mxu1 %vm219_vm1, %v1551_v6 }
 0xd90   :  { %4081 = vmatpush3.bf16.msra.mxu1 %v4078_v43 }
 0xd91   :  { %4083 = vmatprep.subr.bf16.mxu1 %v4082_v7 }
 0xd94   :  { %4085 = vmatpush3.bf16.msra.mxu1 %v4082_v7 }
 0xd95   :  { %4087 = vmatprep.subr.bf16.mxu1 %v4086_v10 }
 0xd98   :  { %4089 = vmatpush3.bf16.msra.mxu1 %v4086_v10  ;;  %v4110_v10 = vpack.c.bf16 %v3365_v9, %v3364_v8 }
 0xd99   :  { %4091 = vmatprep.subr.bf16.mxu1 %v4090_v16 }
 0xd9a   :  { %4111 = vmatprep.subr.bf16.mxu0 %v4110_v10 }
 0xd9b   :  { %4113 = vmatpush3.bf16.msra.mxu0 %v4110_v10 }
 0xd9c   :  { %4093 = vmatpush3.bf16.msra.mxu1 %v4090_v16  ;;  %v4114_v16 = vpack.c.bf16 %v3367_v13, %v3366_v11 }
 0xd9d   :  { %4095 = vmatprep.subr.bf16.mxu1 %v4094_v19 }
 0xd9e   :  { %4115 = vmatprep.subr.bf16.mxu0 %v4114_v16 }
 0xd9f   :  { %4117 = vmatpush3.bf16.msra.mxu0 %v4114_v16 }
 0xda0   :  { %4097 = vmatpush3.bf16.msra.mxu1 %v4094_v19  ;;  %v4118_v19 = vpack.c.bf16 %v3372_v18, %v3370_v17 }
 0xda1   :  { %4099 = vmatprep.subr.bf16.mxu1 %v4098_v30 }
 0xda2   :  { %4119 = vmatprep.subr.bf16.mxu0 %v4118_v19 }
 0xda4   :  { %4101 = vmatpush3.bf16.msra.mxu1 %v4098_v30 }
 0xda5   :  { %4103 = vmatprep.subr.bf16.mxu1 %v4102_v25 }
 0xda8   :  { %4105 = vmatpush3.bf16.msra.mxu1 %v4102_v25 }
 0xda9   :  { %4107 = vmatprep.subr.bf16.mxu1 %v4106_v32 }
 0xdac   :  { %4109 = vmatpush3.bf16.msra.mxu1 %v4106_v32 }
 0xe62   :  { %v3764_v34 = vpop.f32.mrb[14].mxu1 }
 0xe63   :  { %v1641_v35 = vadd.f32 %v3764_v34, %v3356_v33  ;;  %v1635_v36 = vpop.f32.mrb[15].mxu1 }
 0xe64   :  { %v1636_v37 = vadd.f32 %v3356_v33, %v1635_v36 }
 0xe65   :  { %v1647_v38 = vmul.f32 0.70710677, %v1641_v35  ;;  %v1645_v43 = vmul.f32 0.5, %v1641_v35  ;;  %v3363_v35 = vld [vmem:[%s4592_s21 + $0x1] ss:$0 sm:$0xff]  ;;  %s5074_s21 = sld [smem:[#allocation8_spill]] }
 0xe66   :  { %v1646_v14 = vmul.f32 0.70710677, %v1636_v37  ;;  %v1644_v41 = vmul.f32 0.5, %v1636_v37  ;;  %v3369_v37 = vld [vmem:[%s4557_s25 + $0x40] sm:$0xff] }
 0xe67   :  { %4347 = verf.f32 %v1647_v38  ;;  %v3371_v38 = vld [vmem:[%s4557_s25 + $0x50] sm:$0xff] }
 0xe68   :  { %4349 = verf.f32 %v1646_v14 }
 0xe71   :  { %v4348_v3 = vpop.eup %4347 }
 0xe72   :  { %v4350_v39 = vpop.eup %4349  ;;  %v1651_v40 = vadd.f32 1.0, %v4348_v3  ;;  %v3374_v3 = vld [vmem:[%s4557_s25 + $0x68] sm:$0xff] }
 0xe73   :  { %v1650_v42 = vadd.f32 1.0, %v4350_v39  ;;  %v3376_v39 = vld [vmem:[%s4557_s25 + $0x78] sm:$0xff] }
 0xe74   :  { %v1653_v47 = vmul.f32 %v1651_v40, %v1645_v43  ;;  %v4122_v43 = vpack.c.bf16 %v3376_v39, %v3374_v3 }
 0xe75   :  { %v1652_v44 = vmul.f32 %v1650_v42, %v1644_v41  ;;  %v4120_v41 = vpack.c.bf16 %v3371_v38, %v3369_v37 }
 0xe77   :  { %3797 = vmatprep.mubr.f32.mxu1 %v1652_v44  ;;  %v3373_v44 = vld [vmem:[%s4557_s25 + $0x60] sm:$0xff] }
 0xe78   :  { %3798 = vmatmul.mubr.f32.vlgmr.msra.gmra.mrb[16].mxu1 %v1653_v47  ;;  %v3375_v47 = vld [vmem:[%s4557_s25 + $0x70] sm:$0xff]  ;;  %s4456_s25 = smov [#allocation2]  }
 0xe79   :  { %s3281_s29 = sshll.u32 %s4456_s25, 4  ;;  %s3282_s29 = int_to_ptr.vmem [resolvable:$true] %s3281_s29 }
 0xe7a   :  { %s4402_s6 = scalar_lea.vmem %s3282_s29, 256  ;;  %p4407_p1 = scmp.lt.s32.totalorder %s3282_s29, %s3282_s29 }
 0xe7b   :  { %p4403_p0 = scmp.ne.s32.totalorder %s3282_s29, %s4402_s6  ;;  %p4408_p2 = scmp.lt.s32.totalorder %s4402_s6, %s4402_s6 }
 0xe7d   :  { %p4409_p3 = por %p4408_p2, %p4407_p1 }
 0xe7f   :  { %p4410_p4 = pnand %p4409_p3, %p4403_p0 }
 0xf4b   :  { %v3799_v52 = vpop.f32.mrb[16].mxu1 }
 0xf4c   :  { %v1749_v15 = vadd.f32 %v3799_v52, %v3359_v50  ;;  %v1743_v53 = vpop.f32.mrb[17].mxu1  ;;  %v3395_v52 = vld [vmem:[%s5063_s0 + $0x1] ss:$0 sm:$0xff] }
 0xf4d   :  { %v1744_v54 = vadd.f32 %v3359_v50, %v1743_v53  ;;  %v4124_v50 = vpack.c.bf16 %v3375_v47, %v3373_v44 }
 0xf4e   :  { %v4837_v55 = vadd.f32 %v1749_v15, %v4797_v21 }
 0xf4f   :  { %v4840_v56 = vadd.f32 %v1744_v54, %v4800_v22 }
 0xf50   :  { %v1761_v59 = vsel %vm219_vm1, %v4837_v55, 0.0 }
 0xf51   :  { %1762 = vadd.xlane.f32.xlu1 %v1761_v59  ;;  %v1758_v62 = vsel %vm219_vm1, %v4840_v56, 0.0 }
 0xf52   :  { %1759 = vadd.xlane.f32.xlu0 %v1758_v62  ;;  %v3377_v62 = vld [vmem:[%s4542_s20 + $0x2] sm:$0x3] }
 0xfde   :  { %v1763_v63 = vpop.xlane.xlu1 %1762 }
 0xfdf   :  { %v1765_v0 = vmul.f32 0.03125, %v1763_v63  ;;  %v1760_v1 = vpop.xlane.xlu0 %1759 }
 0xfe0   :  { %v1764_v21 = vmul.f32 0.03125, %v1760_v1 }
 0xfe1   :  { %v1767_v2 = vsub.f32 %v4837_v55, %v1765_v0 }
 0xfe2   :  { %v1766_v22 = vsub.f32 %v4840_v56, %v1764_v21 }
 0xfe3   :  { %v1769_v4 = vmul.f32 %v1767_v2, %v1767_v2 }
 0xfe4   :  { %v1768_v5 = vmul.f32 %v1766_v22, %v1766_v22 }
 0xfe5   :  { %v1773_v6 = vsel %vm219_vm1, %v1769_v4, 0.0 }
 0xfe6   :  { %1774 = vadd.xlane.f32.xlu1 %v1773_v6  ;;  %v1770_v7 = vsel %vm219_vm1, %v1768_v5, 0.0 }
 0xfe7   :  { %1771 = vadd.xlane.f32.xlu0 %v1770_v7 }
0x1073   :  { %v1775_v20 = vpop.xlane.xlu1 %1774 }
0x1074   :  { %v1777_v23 = vmul.f32 0.03125, %v1775_v20  ;;  %v1772_v30 = vpop.xlane.xlu0 %1771 }
0x1075   :  { %v1776_v31 = vmul.f32 0.03125, %v1772_v30 }
0x1076   :  { %v1779_v24 = vadd.f32 1e-05, %v1777_v23 }
0x1077   :  { %v1778_v25 = vadd.f32 1e-05, %v1776_v31 }
0x1078   :  { %4351 = vrsqrt.f32 %v1779_v24 }
0x1079   :  { %4353 = vrsqrt.f32 %v1778_v25 }
0x1082   :  { %v4352_v26 = vpop.eup %4351 }
0x1083   :  { %v4354_v32 = vpop.eup %4353  ;;  %v1783_v33 = vmul.f32 %v4352_v26, %v1767_v2 }
0x1084   :  { %v1782_v34 = vmul.f32 %v4354_v32, %v1766_v22 }
0x1085   :  { %v1791_v36 = vmul.f32 %v3362_v29, %v1783_v33 }
0x1086   :  { %v1790_v14 = vmul.f32 %v3362_v29, %v1782_v34 }
0x1087   :  { %v1799_v42 = vadd.f32 %v3363_v35, %v1791_v36 }
0x1088   :  { %v1798_v40 = vadd.f32 %v3363_v35, %v1790_v14 }
0x108a   :  { %3808 = vmatprep.mubr.msk.f32.mxu0 %vm219_vm1, %v1798_v40 }
0x108b   :  { %3809 = vmatmul.mubr.msk.f32.vlgmr.msra.gmra.mrb[10].mxu0 %vm219_vm1, %v1799_v42 }
0x108c   :  { %4121 = vmatpush1.bf16.msra.mxu0 %v4120_v41  ;;  %1999 = vmatprep.mubr.f32.mxu0 %v4455_v12 }
0x108d   :  { %4123 = vmatprep.subr.bf16.mxu0 %v4122_v43 }
0x1090   :  { %4125 = vmatpush1.bf16.msra.mxu0 %v4124_v50 }
0x1093   :  { %3398 = vmatmul.mubr.msk.f32.vlgmr.msra.gmra.mrb[12].mxu0 %vm219_vm1, %v4650_v28  ;;  %v1932_v28 = vrot.slane %v3377_v62, %v570_v49 }
0x1094   :  { %2005 = vmatprep.mubr.f32.mxu0 %v4455_v12 }
0x1097   :  { %3399 = vmatmul.mubr.msk.f32.gmra.mrb[14].mxu0 %vm219_vm1, %v4648_v27  ;;  %v1928_v27 = vrot.slane %v3377_v62, %v566_v51 }
0x115e   :  { %v3810_v15 = vpop.f32.mrb[10].mxu0 }
0x115f   :  { %v1915_v53 = vpop.f32.mrb[11].mxu0  ;;  %v1921_v6 = vadd.f32 %v3810_v15, %v3395_v52 }
0x1160   :  { %v1916_v54 = vadd.f32 %v3395_v52, %v1915_v53 }
0x1161   :  { %v4902_v20 = vmul.f32 0.35355338, %v1921_v6 }
0x1162   :  { %v4873_v59 = vmul.f32 0.35355338, %v1916_v54 }
0x1163   :  { %v2116_v30 = vmul.f32 %v4679_v57, %v4902_v20  ;;  %v2379_v24 = vmul.f32 %v4685_v60, %v4902_v20 }
0x1164   :  { %v2014_v63 = vmul.f32 %v4682_v58, %v4873_v59  ;;  %v2115_v0 = vmul.f32 %v4679_v57, %v4873_v59  ;;  %v2378_v31 = vmul.f32 %v4685_v60, %v4873_v59 }
0x1166   :  { %v2001_v12 = vpop.f32.mrb[12].mxu0  ;;  %3815 = vmatprep.mubr.f32.mxu1 %v2014_v63  ;;  %3822 = vmatprep.mubr.f32.mxu0 %v2115_v0 }
0x1167   :  { %v2003_v1 = vpop.f32.mrb[13].mxu0  ;;  %v2002_v22 = vadd.f32 %v2001_v12, %v1928_v27 }
0x1168   :  { %v2004_v21 = vadd.f32 %v2003_v1, %v1932_v28 }
0x116a   :  { %v2007_v2 = vpop.f32.mrb[14].mxu0  ;;  %v2214_v9 = vmul.f32 %v4679_v57, %v2004_v21  ;;  %v2113_v49 = vmul.f32 %v4682_v58, %v2004_v21  ;;  %v2477_v10 = vmul.f32 %v4685_v60, %v2004_v21  ;;  %v2661_v16 = vmul.f32 %v4688_v61, %v2004_v21 }
0x116b   :  { %v2008_v4 = vadd.f32 %v2007_v2, %v1928_v27  ;;  %v2009_v5 = vpop.f32.mrb[15].mxu0 }
0x116c   :  { %v2010_v7 = vadd.f32 %v2009_v5, %v1932_v28 }
0x116d   :  { %v4884_v8 = vpack.c.bf16 %v2008_v4, %v2002_v22 }
0x116e   :  { %v2215_v11 = vmul.f32 %v4679_v57, %v2010_v7  ;;  %v2114_v48 = vmul.f32 %v4682_v58, %v2010_v7  ;;  %v2478_v51 = vmul.f32 %v4685_v60, %v2010_v7  ;;  %v2662_v13 = vmul.f32 %v4688_v61, %v2010_v7 }
0x116f   :  { %4127 = vmatprep.subr.bf16.mxu1 %v4884_v8  ;;  %4131 = vmatprep.subr.bf16.mxu0 %v4884_v8  ;;  %v2015_v61 = vmul.f32 %v4682_v58, %v4902_v20 }
0x1170   :  { %4129 = vmatpush3.bf16.xpose.msra.mxu1 %v4884_v8  ;;  %4133 = vmatpush3.bf16.xpose.msra.mxu0 %v4884_v8  ;;  %v4134_v17 = vpack.c.bf16 %v2215_v11, %v2214_v9  ;;  %v4898_v18 = vpack.c.bf16 %v2114_v48, %v2113_v49  ;;  %v4900_v19 = vpack.c.bf16 %v2478_v51, %v2477_v10 }
0x1171   :  { %4143 = vmatprep.subr.bf16.mxu0 %v4884_v8  ;;  %v4905_v23 = vpack.c.bf16 %v2662_v13, %v2661_v16 }
0x1172   :  { %4135 = vmatprep.subr.bf16.mxu1 %v4134_v17 }
0x1177   :  { %3816 = vmatmul.mubr.f32.vlgmr.msra.gmra.mrb[18].mxu1 %v2015_v61  ;;  %3823 = vmatmul.mubr.f32.vlgmr.msra.gmra.mrb[16].mxu0 %v2116_v30 }
0x1178   :  { %4137 = vmatpush3.bf16.msra.mxu1 %v4134_v17  ;;  %4145 = vmatpush3.bf16.xpose.msra.mxu0 %v4884_v8 }
0x1179   :  { %3843 = vmatprep.mubr.f32.mxu0 %v2378_v31  ;;  %4139 = vmatprep.subr.bf16.mxu1 %v4898_v18 }
0x117f   :  { %3844 = vmatmul.mubr.f32.vlgmr.msra.gmra.mrb[18].mxu0 %v2379_v24 }
0x124a   :  { %v3817_v25 = vpop.f32.mrb[18].mxu1  ;;  %v3824_v57 = vpop.f32.mrb[16].mxu0 }
0x124b   :  { %v2189_v26 = vadd.f32 %v3824_v57, %v4724_v45  ;;  %v2082_v58 = vpop.f32.mrb[19].mxu1  ;;  %v2183_v29 = vpop.f32.mrb[17].mxu0  ;;  %v2088_v33 = vadd.f32 %v3817_v25, %v4724_v45 }
0x124c   :  { %v2184_v32 = vadd.f32 %v2183_v29, %v4727_v46  ;;  %v2083_v35 = vadd.f32 %v2082_v58, %v4727_v46 }
0x124d   :  { %v2195_v34 = vsel %vm745_vm2, %v2189_v26, -inf  ;;  %v2094_v60 = vsel %vm745_vm2, %v2088_v33, -inf }
0x124e   :  { %2196 = vmax.xlane.f32.xlu1 %v2195_v34  ;;  %v2192_v36 = vsel %vm745_vm2, %v2184_v32, -inf  ;;  %v2091_v38 = vsel %vm745_vm2, %v2083_v35, -inf }
0x124f   :  { %2193 = vmax.xlane.f32.xlu0 %v2192_v36  ;;  %v4399_v36 = vld [vmem:[%s4477_s13 + $0x3] ss:$0 sm:$0xff]  ;;  %s5072_s13 = sld [smem:[#allocation9_spill]] }
0x1252   :  { %v3845_v37 = vpop.f32.mrb[18].mxu0  ;;  %2095 = vmax.xlane.f32.xlu1 %v2094_v60  ;;  %v2562_v60 = vmul.f32 %v4399_v36, %v4873_v59 }
0x1253   :  { %v2452_v14 = vadd.f32 %v3845_v37, %v4724_v45  ;;  %v2446_v3 = vpop.f32.mrb[19].mxu0  ;;  %2092 = vmax.xlane.f32.xlu0 %v2091_v38  ;;  %v2563_v37 = vmul.f32 %v4399_v36, %v4902_v20  ;;  %v4400_v38 = vld [vmem:[%s5064_s5 + $0x8] sm:$0xff] }
0x1254   :  { %v2447_v39 = vadd.f32 %v2446_v3, %v4727_v46 }
0x1255   :  { %v2458_v40 = vsel %vm745_vm2, %v2452_v14, -inf }
0x1256   :  { %2459 = vmax.xlane.f32.xlu1 %v2458_v40  ;;  %v2455_v41 = vsel %vm745_vm2, %v2447_v39, -inf }
0x1257   :  { %2456 = vmax.xlane.f32.xlu0 %v2455_v41 }
0x12db   :  { %v2197_v42 = vpop.xlane.xlu1 %2196 }
0x12dc   :  { %v2199_v43 = vsub.f32 %v2189_v26, %v2197_v42  ;;  %v2194_v44 = vpop.xlane.xlu0 %2193 }
0x12dd   :  { %v2198_v47 = vsub.f32 %v2184_v32, %v2194_v44 }
0x12de   :  { %v2202_v50 = vmul.f32 1.442695, %v2199_v43 }
0x12df   :  { %v2200_v52 = vmul.f32 1.442695, %v2198_v47  ;;  %v2096_v15 = vpop.xlane.xlu1 %2095 }
0x12e0   :  { %4355 = vpow2.f32 %v2202_v50  ;;  %v2098_v53 = vsub.f32 %v2088_v33, %v2096_v15  ;;  %v2093_v45 = vpop.xlane.xlu0 %2092 }
0x12e1   :  { %4357 = vpow2.f32 %v2200_v52  ;;  %v2097_v54 = vsub.f32 %v2083_v35, %v2093_v45  ;;  %v3379_v45 = vld [vmem:[%s5065_s3 + $0x88] sm:$0xff] }
0x12e2   :  { %v2101_v62 = vmul.f32 1.442695, %v2098_v53  ;;  %v3378_v53 = vld [vmem:[%s5065_s3 + $0x80] sm:$0xff] }
0x12e3   :  { %v2099_v46 = vmul.f32 1.442695, %v2097_v54  ;;  %v2460_v63 = vpop.xlane.xlu1 %2459  ;;  %v3380_v54 = vld [vmem:[%s5065_s3 + $0x90] sm:$0xff] }
0x12e4   :  { %4359 = vpow2.f32 %v2101_v62  ;;  %v2462_v0 = vsub.f32 %v2452_v14, %v2460_v63  ;;  %v2457_v28 = vpop.xlane.xlu0 %2456  ;;  %v4158_v62 = vpack.c.bf16 %v3379_v45, %v3378_v53 }
0x12e5   :  { %4361 = vpow2.f32 %v2099_v46  ;;  %v2461_v12 = vsub.f32 %v2447_v39, %v2457_v28  ;;  %v4401_v39 = vld [vmem:[%s5064_s5] sm:$0xff]  ;;  %v3381_v46 = vld [vmem:[%s5065_s3 + $0x98] sm:$0xff]  ;;  %v3383_v28 = vld [vmem:[%s5065_s3 + $0xa8] sm:$0xff] }
0x12e6   :  { %v2465_v27 = vmul.f32 1.442695, %v2462_v0  ;;  %v4162_v63 = vpack.c.bf16 %v3381_v46, %v3380_v54  ;;  %v3382_v0 = vld [vmem:[%s5065_s3 + $0xa0] sm:$0xff]  ;;  %4159 = vmatprep.subr.bf16.mxu0 %v4158_v62 }
0x12e7   :  { %v2463_v1 = vmul.f32 1.442695, %v2461_v12  ;;  %4161 = vmatpush3.bf16.msra.mxu0 %v4158_v62  ;;  %v4166_v12 = vpack.c.bf16 %v3383_v28, %v3382_v0  ;;  %v3411_v62 = vld [vmem:[%s4607_s9 + $0x1] ss:$0 sm:$0xff]  ;;  %s5071_s9 = sld [smem:[#allocation7_spill]] }
0x12e8   :  { %4363 = vpow2.f32 %v2465_v27  ;;  %4163 = vmatprep.subr.bf16.mxu0 %v4162_v63  ;;  %v3384_v27 = vld [vmem:[%s5065_s3 + $0xb0] sm:$0xff]  ;;  %v3412_v28 = vld [vmem:[%s4602_s17 + $0x1] ss:$0 sm:$0xff]  ;;  %s5073_s17 = sld [smem:[#allocation6_spill]] }
0x12e9   :  { %4365 = vpow2.f32 %v2463_v1  ;;  %v3385_v1 = vld [vmem:[%s5065_s3 + $0xb8] sm:$0xff] }
0x12ea   :  { %v4356_v21 = vpop.eup %4355 }
0x12eb   :  { %v4358_v2 = vpop.eup %4357  ;;  %v2207_v22 = vsel %vm745_vm2, %v4356_v21, 0.0  ;;  %4165 = vmatpush3.bf16.msra.mxu0 %v4162_v63 }
0x12ec   :  { %2208 = vadd.xlane.f32.xlu1 %v2207_v22  ;;  %v2204_v4 = vsel %vm745_vm2, %v4358_v2, 0.0  ;;  %4167 = vmatprep.subr.bf16.mxu0 %v4166_v12  ;;  %v3387_v22 = vld [vmem:[%s5065_s3 + $0xc8] sm:$0xff] }
0x12ed   :  { %2205 = vadd.xlane.f32.xlu0 %v2204_v4 }
0x12ee   :  { %v4360_v5 = vpop.eup %4359 }
0x12ef   :  { %v4362_v6 = vpop.eup %4361  ;;  %v2106_v7 = vsel %vm745_vm2, %v4360_v5, 0.0  ;;  %4169 = vmatpush3.bf16.msra.mxu0 %v4166_v12 }
0x12f0   :  { %2107 = vadd.xlane.f32.xlu1 %v2106_v7  ;;  %v2103_v9 = vsel %vm745_vm2, %v4362_v6, 0.0 }
0x12f1   :  { %2104 = vadd.xlane.f32.xlu0 %v2103_v9  ;;  %v3390_v9 = vld [vmem:[%s5065_s3 + $0xe0] sm:$0xff] }
0x12f2   :  { %v4364_v49 = vpop.eup %4363 }
0x12f3   :  { %v4366_v10 = vpop.eup %4365  ;;  %v2470_v11 = vsel %vm745_vm2, %v4364_v49, 0.0 }
0x12f4   :  { %2471 = vadd.xlane.f32.xlu1 %v2470_v11  ;;  %v2467_v48 = vsel %vm745_vm2, %v4366_v10, 0.0  ;;  %v3392_v11 = vld [vmem:[%s5065_s3 + $0xf0] sm:$0xff] }
0x12f5   :  { %2468 = vadd.xlane.f32.xlu0 %v2467_v48  ;;  %v3393_v48 = vld [vmem:[%s5065_s3 + $0xf8] sm:$0xff] }
0x1379   :  { %v2209_v51 = vpop.xlane.xlu1 %2208 }
0x137a   :  { %4367 = vrcp.f32 %v2209_v51  ;;  %v2206_v13 = vpop.xlane.xlu0 %2205  ;;  %v4186_v51 = vpack.c.bf16 %v3393_v48, %v3392_v11  ;;  %v3429_v11 = vld [vmem:[%s5068_s19 + $0xc0] sm:$0xff]  ;;  %v3430_v48 = vld [vmem:[%s5068_s19 + $0xc8] sm:$0xff] }
0x137b   :  { %4369 = vrcp.f32 %v2206_v13 }
0x137d   :  { %v2108_v17 = vpop.xlane.xlu1 %2107 }
0x137e   :  { %v2105_v16 = vpop.xlane.xlu0 %2104 }
0x137f   :  { %4371 = vrcp.f32 %v2105_v16 }
0x1380   :  { %4373 = vrcp.f32 %v2108_v17 }
0x1381   :  { %v2472_v57 = vpop.xlane.xlu1 %2471 }
0x1382   :  { %v2469_v30 = vpop.xlane.xlu0 %2468 }
0x1383   :  { %4375 = vrcp.f32 %v2469_v30 }
0x1384   :  { %v4368_v61 = vpop.eup %4367  ;;  %4377 = vrcp.f32 %v2472_v57  ;;  %v3408_v57 = vld [vmem:[%s5066_s8 + $0x1] ss:$0 sm:$0xff] }
0x1385   :  { %v4370_v31 = vpop.eup %4369  ;;  %v2213_v25 = vmul.f32 %v4368_v61, %v4356_v21  ;;  %v4170_v21 = vpack.c.bf16 %v3385_v1, %v3384_v27  ;;  %v3423_v1 = vld [vmem:[%s5068_s19 + $0x90] sm:$0xff] }
0x1386   :  { %v2212_v24 = vmul.f32 %v4370_v31, %v4358_v2  ;;  %v3386_v2 = vld [vmem:[%s5065_s3 + $0xc0] sm:$0xff] }
0x1387   :  { %4171 = vmatprep.subr.bf16.mxu0 %v4170_v21  ;;  %v4174_v4 = vpack.c.bf16 %v3387_v22, %v3386_v2 }
0x1388   :  { %3829 = vmatprep.mubr.msk.f32.mxu1 %vm745_vm2, %v2212_v24  ;;  %4173 = vmatpush3.bf16.msra.mxu0 %v4170_v21  ;;  %v3424_v21 = vld [vmem:[%s5068_s19 + $0x98] sm:$0xff] }
0x1389   :  { %v4372_v26 = vpop.eup %4371  ;;  %3830 = vmatmul.mubr.msk.f32.vlgmr.msra.gmra.mrb[20].mxu1 %vm745_vm2, %v2213_v25  ;;  %4175 = vmatprep.subr.bf16.mxu0 %v4174_v4 }
0x138a   :  { %4141 = vmatpush3.bf16.msra.mxu1 %v4898_v18  ;;  %v2111_v58 = vmul.f32 %v4372_v26, %v4362_v6  ;;  %v4374_v29 = vpop.eup %4373  ;;  %v3389_v6 = vld [vmem:[%s5065_s3 + $0xd8] sm:$0xff] }
0x138b   :  { %4147 = vmatprep.subr.bf16.mxu1 %v4900_v19  ;;  %v2112_v33 = vmul.f32 %v4374_v29, %v4360_v5  ;;  %v3388_v5 = vld [vmem:[%s5065_s3 + $0xd0] sm:$0xff] }
0x138c   :  { %3836 = vmatprep.mubr.msk.f32.mxu1 %vm745_vm2, %v2111_v58  ;;  %v4178_v7 = vpack.c.bf16 %v3389_v6, %v3388_v5  ;;  %4177 = vmatpush3.bf16.msra.mxu0 %v4174_v4  ;;  %v4202_v4 = vpack.c.bf16 %v3424_v21, %v3423_v1  ;;  %v3425_v5 = vld [vmem:[%s5068_s19 + $0xa0] sm:$0xff]  ;;  %v3426_v6 = vld [vmem:[%s5068_s19 + $0xa8] sm:$0xff] }
0x138d   :  { %v4376_v32 = vpop.eup %4375 }
0x138e   :  { %v2475_v34 = vmul.f32 %v4376_v32, %v4366_v10  ;;  %v4378_v18 = vpop.eup %4377  ;;  %4179 = vmatprep.subr.bf16.mxu0 %v4178_v7 }
0x138f   :  { %v2476_v35 = vmul.f32 %v4378_v18, %v4364_v49  ;;  %v3391_v49 = vld [vmem:[%s5065_s3 + $0xe8] sm:$0xff] }
0x1390   :  { %v4182_v10 = vpack.c.bf16 %v3391_v49, %v3390_v9  ;;  %4181 = vmatpush3.bf16.msra.mxu0 %v4178_v7  ;;  %v4206_v7 = vpack.c.bf16 %v3426_v6, %v3425_v5  ;;  %v3427_v9 = vld [vmem:[%s5068_s19 + $0xb0] sm:$0xff]  ;;  %v3428_v49 = vld [vmem:[%s5068_s19 + $0xb8] sm:$0xff]  ;;  %v3442_v6 = vld [vmem:[%s5074_s21] ss:$0 sm:$0xff] }
0x1391   :  { %3837 = vmatmul.mubr.msk.f32.vlgmr.msra.gmra.mrb[20].mxu1 %vm745_vm2, %v2112_v33 }
0x1392   :  { %4149 = vmatpush3.bf16.msra.mxu1 %v4900_v19  ;;  %3850 = vmatprep.mubr.msk.f32.mxu1 %vm745_vm2, %v2475_v34 }
0x1393   :  { %4151 = vmatprep.subr.bf16.mxu1 %v4884_v8  ;;  %4183 = vmatprep.subr.bf16.mxu0 %v4182_v10 }
0x1394   :  { %4185 = vmatpush3.bf16.msra.mxu0 %v4182_v10  ;;  %v4210_v10 = vpack.c.bf16 %v3428_v49, %v3427_v9 }
0x1395   :  { %4187 = vmatprep.subr.bf16.mxu0 %v4186_v51 }
0x1398   :  { %4189 = vmatpush3.bf16.msra.mxu0 %v4186_v51  ;;  %v4214_v51 = vpack.c.bf16 %v3430_v48, %v3429_v11 }
0x1399   :  { %3851 = vmatmul.mubr.msk.f32.vlgmr.msra.gmra.mrb[20].mxu1 %vm745_vm2, %v2476_v35 }
0x139a   :  { %3857 = vmatprep.mubr.f32.mxu1 %v2562_v60 }
0x139b   :  { %4153 = vmatpush3.bf16.xpose.msra.mxu1 %v4884_v8 }
0x139c   :  { %4155 = vmatprep.subr.bf16.mxu1 %v4905_v23 }
0x13a2   :  { %3858 = vmatmul.mubr.f32.vlgmr.msra.gmra.mrb[22].mxu1 %v2563_v37 }
0x13a3   :  { %4157 = vmatpush3.bf16.msra.mxu1 %v4905_v23 }
0x1475   :  { %v3859_v19 = vpop.f32.mrb[22].mxu1 }
0x1476   :  { %v2636_v14 = vadd.f32 %v4400_v38, %v3859_v19  ;;  %v2630_v3 = vpop.f32.mrb[23].mxu1 }
0x1477   :  { %v2631_v40 = vadd.f32 %v4401_v39, %v2630_v3 }
0x1478   :  { %v2642_v59 = vsel %vm745_vm2, %v2636_v14, -inf }
0x1479   :  { %2643 = vmax.xlane.f32.xlu1 %v2642_v59  ;;  %v2639_v41 = vsel %vm745_vm2, %v2631_v40, -inf  ;;  %v3414_v59 = vld [vmem:[%s5067_s14 + $0x28] sm:$0xff] }
0x147a   :  { %2640 = vmax.xlane.f32.xlu0 %v2639_v41 }
0x1506   :  { %v2644_v8 = vpop.xlane.xlu1 %2643 }
0x1507   :  { %v2646_v20 = vsub.f32 %v2636_v14, %v2644_v8  ;;  %v2641_v42 = vpop.xlane.xlu0 %2640  ;;  %v3415_v8 = vld [vmem:[%s5067_s14 + $0x30] sm:$0xff] }
0x1508   :  { %v2645_v23 = vsub.f32 %v2631_v40, %v2641_v42  ;;  %v3413_v40 = vld [vmem:[%s5067_s14 + $0x20] sm:$0xff] }
0x1509   :  { %v2649_v43 = vmul.f32 1.442695, %v2646_v20  ;;  %v4190_v41 = vpack.c.bf16 %v3414_v59, %v3413_v40  ;;  %v3416_v20 = vld [vmem:[%s5067_s14 + $0x38] sm:$0xff] }
0x150a   :  { %v2647_v44 = vmul.f32 1.442695, %v2645_v23  ;;  %v4194_v42 = vpack.c.bf16 %v3416_v20, %v3415_v8  ;;  %v3421_v23 = vld [vmem:[%s5068_s19 + $0x80] sm:$0xff]  ;;  %v3084_v8 = vld [vmem:[%s5071_s9 + $0x18] sm:$0xff] }
0x150b   :  { %4379 = vpow2.f32 %v2649_v43  ;;  %4191 = vmatprep.subr.bf16.mxu1 %v4190_v41  ;;  %v3422_v43 = vld [vmem:[%s5068_s19 + $0x88] sm:$0xff] }
0x150c   :  { %4381 = vpow2.f32 %v2647_v44  ;;  %v4198_v44 = vpack.c.bf16 %v3422_v43, %v3421_v23  ;;  %v3176_v23 = vld [vmem:[%s5072_s13 + $0x8] sm:$0xff] }
0x1515   :  { %v4380_v47 = vpop.eup %4379 }
0x1516   :  { %v4382_v50 = vpop.eup %4381  ;;  %v2654_v52 = vsel %vm745_vm2, %v4380_v47, 0.0 }
0x1517   :  { %2655 = vadd.xlane.f32.xlu1 %v2654_v52  ;;  %v2651_v15 = vsel %vm745_vm2, %v4382_v50, 0.0 }
0x1518   :  { %2652 = vadd.xlane.f32.xlu0 %v2651_v15 }
0x15a4   :  { %v2656_v13 = vpop.xlane.xlu1 %2655 }
0x15a5   :  { %4383 = vrcp.f32 %v2656_v13  ;;  %v2653_v16 = vpop.xlane.xlu0 %2652  ;;  %v3431_v13 = vld [vmem:[%s5068_s19 + $0xd0] sm:$0xff] }
0x15a6   :  { %4385 = vrcp.f32 %v2653_v16  ;;  %v3432_v16 = vld [vmem:[%s5068_s19 + $0xd8] sm:$0xff] }
0x15af   :  { %v4384_v17 = vpop.eup %4383 }
0x15b0   :  { %v4386_v30 = vpop.eup %4385  ;;  %v2660_v31 = vmul.f32 %v4384_v17, %v4380_v47  ;;  %v4218_v17 = vpack.c.bf16 %v3432_v16, %v3431_v13 }
0x15b1   :  { %v2659_v61 = vmul.f32 %v4386_v30, %v4382_v50  ;;  %v3433_v30 = vld [vmem:[%s5068_s19 + $0xe0] sm:$0xff] }
0x15b3   :  { %3864 = vmatprep.mubr.msk.f32.mxu1 %vm745_vm2, %v2659_v61  ;;  %v3434_v61 = vld [vmem:[%s5068_s19 + $0xe8] sm:$0xff] }
0x15b4   :  { %3865 = vmatmul.mubr.msk.f32.vlgmr.msra.gmra.mrb[20].mxu1 %vm745_vm2, %v2660_v31  ;;  %v4222_v31 = vpack.c.bf16 %v3434_v61, %v3433_v30 }
0x15b5   :  { %4193 = vmatpush3.bf16.msra.mxu1 %v4190_v41  ;;  %v3083_v41 = vld [vmem:[%s5071_s9 + $0x10] sm:$0xff] }
0x15b6   :  { %4195 = vmatprep.subr.bf16.mxu1 %v4194_v42  ;;  %v4234_v20 = vpack.c.bf16 %v3084_v8, %v3083_v41 }
0x15b9   :  { %4197 = vmatpush3.bf16.msra.mxu1 %v4194_v42  ;;  %v3175_v42 = vld [vmem:[%s5072_s13] sm:$0xff] }
0x15ba   :  { %4199 = vmatprep.subr.bf16.mxu1 %v4198_v44  ;;  %v4238_v43 = vpack.c.bf16 %v3176_v23, %v3175_v42 }
0x1687   :  { %v3866_v24 = vpop.f32.mrb[20].mxu1 }
0x1688   :  { %v2735_v25 = vpop.f32.mrb[21].mxu1 }
0x1689   :  { %3899 = vmatprep.mubr.f32.mxu0 %v2735_v25  ;;  %v3436_v25 = vld [vmem:[%s5068_s19 + $0xf8] sm:$0xff] }
0x168a   :  { %3900 = vmatmul.mubr.f32.vlgmr.msra.gmra.mrb[20].mxu0 %v3866_v24  ;;  %v3435_v24 = vld [vmem:[%s5068_s19 + $0xf0] sm:$0xff] }
0x175d   :  { %v3901_v26 = vpop.f32.mrb[20].mxu0 }
0x175e   :  { %v2824_v58 = vadd.f32 %v3901_v26, %v3408_v57  ;;  %v2818_v29 = vpop.f32.mrb[21].mxu0  ;;  %v3081_v26 = vld [vmem:[%s5071_s9] sm:$0xff] }
0x175f   :  { %v2819_v32 = vadd.f32 %v3408_v57, %v2818_v29  ;;  %v4226_v57 = vpack.c.bf16 %v3436_v25, %v3435_v24 }
0x1760   :  { %v4977_v33 = vadd.f32 %v2824_v58, %v4837_v55  ;;  %v3082_v58 = vld [vmem:[%s5071_s9 + $0x8] sm:$0xff] }
0x1761   :  { %v4980_v34 = vadd.f32 %v2819_v32, %v4840_v56  ;;  %v4230_v29 = vpack.c.bf16 %v3082_v58, %v3081_v26  ;;  %v3418_v32 = vld [vmem:[%s5069_s24 + $0x1] ss:$0 sm:$0xff] }
0x1762   :  { %v2836_v18 = vsel %vm219_vm1, %v4977_v33, 0.0 }
0x1763   :  { %2837 = vadd.xlane.f32.xlu1 %v2836_v18  ;;  %v2833_v35 = vsel %vm219_vm1, %v4980_v34, 0.0  ;;  %4231 = vmatprep.subr.bf16.mxu0 %v4230_v29 }
0x1764   :  { %2834 = vadd.xlane.f32.xlu0 %v2833_v35  ;;  %4233 = vmatpush3.bf16.msra.mxu0 %v4230_v29 }
0x1765   :  { %4235 = vmatprep.subr.bf16.mxu0 %v4234_v20 }
0x1768   :  { %4237 = vmatpush3.bf16.msra.mxu0 %v4234_v20 }
0x1769   :  { %4239 = vmatprep.subr.bf16.mxu0 %v4238_v43 }
0x17f0   :  { %v2838_v36 = vpop.xlane.xlu1 %2837 }
0x17f1   :  { %v2840_v60 = vmul.f32 0.03125, %v2838_v36  ;;  %v2835_v37 = vpop.xlane.xlu0 %2834 }
0x17f2   :  { %v2839_v55 = vmul.f32 0.03125, %v2835_v37 }
0x17f3   :  { %v2842_v19 = vsub.f32 %v4977_v33, %v2840_v60 }
0x17f4   :  { %v2841_v56 = vsub.f32 %v4980_v34, %v2839_v55 }
0x17f5   :  { %v2844_v38 = vmul.f32 %v2842_v19, %v2842_v19 }
0x17f6   :  { %v2843_v14 = vmul.f32 %v2841_v56, %v2841_v56 }
0x17f7   :  { %v2848_v3 = vsel %vm219_vm1, %v2844_v38, 0.0 }
0x17f8   :  { %2849 = vadd.xlane.f32.xlu1 %v2848_v3  ;;  %v2845_v39 = vsel %vm219_vm1, %v2843_v14, 0.0 }
0x17f9   :  { %2846 = vadd.xlane.f32.xlu0 %v2845_v39 }
0x1885   :  { %v2850_v47 = vpop.xlane.xlu1 %2849 }
0x1886   :  { %v2852_v50 = vmul.f32 0.03125, %v2850_v47  ;;  %v2847_v52 = vpop.xlane.xlu0 %2846 }
0x1887   :  { %v2851_v15 = vmul.f32 0.03125, %v2847_v52 }
0x1888   :  { %v2854_v53 = vadd.f32 1e-05, %v2852_v50 }
0x1889   :  { %v2853_v45 = vadd.f32 1e-05, %v2851_v15 }
0x188a   :  { %4387 = vrsqrt.f32 %v2854_v53  ;;  %v3177_v53 = vld [vmem:[%s5072_s13 + $0x10] sm:$0xff] }
0x188b   :  { %4389 = vrsqrt.f32 %v2853_v45  ;;  %v3178_v45 = vld [vmem:[%s5072_s13 + $0x18] sm:$0xff] }
0x1894   :  { %v4388_v54 = vpop.eup %4387 }
0x1895   :  { %v4390_v46 = vpop.eup %4389  ;;  %v2858_v63 = vmul.f32 %v4388_v54, %v2842_v19 }
0x1896   :  { %v2857_v0 = vmul.f32 %v4390_v46, %v2841_v56  ;;  %v4242_v46 = vpack.c.bf16 %v3178_v45, %v3177_v53 }
0x1897   :  { %v2866_v12 = vmul.f32 %v3411_v62, %v2858_v63  ;;  %v3179_v63 = vld [vmem:[%s5072_s13 + $0x20] sm:$0xff] }
0x1898   :  { %v2865_v27 = vmul.f32 %v3411_v62, %v2857_v0  ;;  %v3180_v0 = vld [vmem:[%s5072_s13 + $0x28] sm:$0xff] }
0x1899   :  { %v2874_v22 = vadd.f32 %v3412_v28, %v2866_v12  ;;  %v3181_v12 = vld [vmem:[%s5072_s13 + $0x30] sm:$0xff] }
0x189a   :  { %v2873_v2 = vadd.f32 %v3412_v28, %v2865_v27  ;;  %v4246_v28 = vpack.c.bf16 %v3180_v0, %v3179_v63  ;;  %v3182_v27 = vld [vmem:[%s5072_s13 + $0x38] sm:$0xff] }
0x189c   :  { %3910 = vmatprep.mubr.msk.f32.mxu1 %vm219_vm1, %v2873_v2 }
0x189d   :  { %3911 = vmatmul.mubr.msk.f32.vlgmr.msra.gmra.mrb[24].mxu1 %vm219_vm1, %v2874_v22 }
0x189e   :  { %4201 = vmatpush3.bf16.msra.mxu1 %v4198_v44  ;;  %v3438_v44 = vld [vmem:[%s5070_s30 + $0x1] ss:$0 sm:$0xff] }
0x189f   :  { %4203 = vmatprep.subr.bf16.mxu1 %v4202_v4 }
0x18a2   :  { %4205 = vmatpush3.bf16.msra.mxu1 %v4202_v4 }
0x18a3   :  { %4207 = vmatprep.subr.bf16.mxu1 %v4206_v7 }
0x18a6   :  { %4209 = vmatpush3.bf16.msra.mxu1 %v4206_v7 }
0x18a7   :  { %4211 = vmatprep.subr.bf16.mxu1 %v4210_v10 }
0x18aa   :  { %4213 = vmatpush3.bf16.msra.mxu1 %v4210_v10 }
0x18ab   :  { %4215 = vmatprep.subr.bf16.mxu1 %v4214_v51 }
0x18ae   :  { %4217 = vmatpush3.bf16.msra.mxu1 %v4214_v51 }
0x18af   :  { %4219 = vmatprep.subr.bf16.mxu1 %v4218_v17 }
0x18b2   :  { %4221 = vmatpush3.bf16.msra.mxu1 %v4218_v17 }
0x18b3   :  { %4223 = vmatprep.subr.bf16.mxu1 %v4222_v31 }
0x18b6   :  { %4225 = vmatpush3.bf16.msra.mxu1 %v4222_v31 }
0x18b7   :  { %4227 = vmatprep.subr.bf16.mxu1 %v4226_v57 }
0x18ba   :  { %4229 = vmatpush3.bf16.msra.mxu1 %v4226_v57 }
0x1970   :  { %v3912_v18 = vpop.f32.mrb[24].mxu1 }
0x1971   :  { %v2966_v35 = vadd.f32 %v3912_v18, %v3418_v32  ;;  %v2960_v36 = vpop.f32.mrb[25].mxu1 }
0x1972   :  { %v2961_v60 = vadd.f32 %v3418_v32, %v2960_v36 }
0x1973   :  { %v2972_v37 = vmul.f32 0.70710677, %v2966_v35  ;;  %v2970_v39 = vmul.f32 0.5, %v2966_v35 }
0x1974   :  { %v2971_v55 = vmul.f32 0.70710677, %v2961_v60  ;;  %v2969_v14 = vmul.f32 0.5, %v2961_v60 }
0x1975   :  { %4391 = verf.f32 %v2972_v37 }
0x1976   :  { %4393 = verf.f32 %v2971_v55 }
0x197f   :  { %v4392_v19 = vpop.eup %4391 }
0x1980   :  { %v4394_v56 = vpop.eup %4393  ;;  %v2976_v38 = vadd.f32 1.0, %v4392_v19 }
0x1981   :  { %v2975_v3 = vadd.f32 1.0, %v4394_v56 }
0x1982   :  { %v2978_v59 = vmul.f32 %v2976_v38, %v2970_v39 }
0x1983   :  { %v2977_v40 = vmul.f32 %v2975_v3, %v2969_v14 }
0x1985   :  { %3945 = vmatprep.mubr.f32.mxu1 %v2977_v40 }
0x1986   :  { %3946 = vmatmul.mubr.f32.vlgmr.msra.gmra.mrb[26].mxu1 %v2978_v59 }
0x1a59   :  { %v3947_v47 = vpop.f32.mrb[26].mxu1 }
0x1a5a   :  { %v3076_v50 = vadd.f32 %v3947_v47, %v3438_v44  ;;  %v3070_v52 = vpop.f32.mrb[27].mxu1 }
0x1a5b   :  { %v3071_v15 = vadd.f32 %v3438_v44, %v3070_v52 }
0x1a5c   :  { %v3080_v62 = vadd.f32 %v3076_v50, %v4977_v33  ;;  %v3439_v33 = vld [vmem:[%s5073_s17] ss:$0 sm:$0xff] }
0x1a5d   :  { %v3079_v54 = vadd.f32 %v3071_v15, %v4980_v34  ;;  %v4250_v34 = vpack.c.bf16 %v3182_v27, %v3181_v12 }
0x1a5f   :  { %3956 = vmatprep.mubr.msk.f32.mxu0 %vm219_vm1, %v3079_v54 }
0x1a60   :  { %3957 = vmatmul.mubr.msk.f32.vlgmr.msra.gmra.mrb[22].mxu0 %vm219_vm1, %v3080_v62 }
0x1a61   :  { %4241 = vmatpush3.bf16.msra.mxu0 %v4238_v43 }
0x1a62   :  { %4243 = vmatprep.subr.bf16.mxu0 %v4242_v46 }
0x1a65   :  { %4245 = vmatpush3.bf16.msra.mxu0 %v4242_v46 }
0x1a66   :  { %4247 = vmatprep.subr.bf16.mxu0 %v4246_v28 }
0x1a69   :  { %4249 = vmatpush3.bf16.msra.mxu0 %v4246_v28 }
0x1a6a   :  { %4251 = vmatprep.subr.bf16.mxu0 %v4250_v34 }
0x1a6d   :  { %4253 = vmatpush3.bf16.msra.mxu0 %v4250_v34 }
0x1b33   :  { %v3958_v1 = vpop.f32.mrb[22].mxu0 }
0x1b34   :  { %v3170_v21 = vadd.f32 %v3958_v1, %v3439_v33  ;;  %v3164_v2 = vpop.f32.mrb[23].mxu0 }
0x1b35   :  { %v3165_v22 = vadd.f32 %v3439_v33, %v3164_v2 }
0x1b36   :  { %v3174_v5 = vmax.f32 %v3170_v21, 0.0 }
0x1b37   :  { %v3173_v4 = vmax.f32 %v3165_v22, 0.0 }
0x1b39   :  { %3975 = vmatprep.mubr.msk.f32.mxu0 %vm3190_vm3, %v3173_v4 }
0x1b3a   :  { %3976 = vmatmul.mubr.msk.f32.vlgmr.msra.gmra.mrb[24].mxu0 %vm3190_vm3, %v3174_v5 }
0x1c0d   :  { %v3977_v7 = vpop.f32.mrb[24].mxu0 }
0x1c0e   :  { %v3269_v9 = vadd.f32 %v3977_v7, %v3442_v6  ;;  %v3263_v49 = vpop.f32.mrb[25].mxu0 }
0x1c0f   :  { %v3264_v10 = vadd.f32 %v3442_v6, %v3263_v49 }
0x1c10   :  { %4395 = vtanh.f32 %v3269_v9 }
0x1c11   :  { %4397 = vtanh.f32 %v3264_v10 }
0x1c1a   :  { %v4396_v11 = vpop.eup %4395 }
0x1c1b   :  { %v4398_v48 = vpop.eup %4397  ;;  %3275 = vst.msk [vmem:[#allocation2 + $0x8] sm:$0xff] %vm745_vm2, %v4396_v11 }
0x1c1c   :  { %3274 = vst.msk [vmem:[#allocation2] sm:$0xff] %vm745_vm2, %v4398_v48 }
0x1c1d   :  { %4413 = shalt.err (!%p4410_p4)
}
0x1c1e   :  { %s4414_s12 = scalar_lea.hbm %s4612_s4, 256 }
0x1c1f   :  { %p4415_p5 = scmp.ne.s32.totalorder %s4612_s4, %s4414_s12  ;;  %p4418_p6 = scmp.lt.u32.totalorder %s4414_s12, %s4612_s4 }
0x1c21   :  { %p4420_p7 = pnand %p4418_p6, %p4415_p5 }
0x1c23   :  { %4423 = shalt.err (!%p4420_p7)
}
0x1c24   :  { %s4457_s20 = smov 128   ;;  %s4458_s27 = smov 8  }
0x1c25   :  { %3287 = dma.vmem_to_hbm [thread:$0]  %s3282_s29, 256, %s4612_s4, [#allocation3], %s4457_s20, %s4457_s20, %s4458_s27  }
0x1c26   :  { %4424 = dma.done.wait [#allocation3], 256  }
0x1c27   :  { %4425 = vsyncadd [#allocation3], 4294967040 }
0x1c28   :  { %3291 = vsyncpa [#allocation3], 1 }

</bundles_post_ra>
